<compile_context>
chip_gen: v7x
topology: tpu7x:2x2x1
jax: 0.10.0
libtpu: 0.0.40
codegen_flags: <defaults>
</compile_context>

<pallas_src>
import functools
import itertools

import jax
import jax.numpy as jnp
import numpy as np
from jax import lax
from jax.experimental import pallas as pl
from jax.experimental.pallas import tpu as pltpu

_LANE = 128
_TAPS = tuple(itertools.product(range(3), range(3)))   # (dy, dx), row-major == w.reshape(9, ...)


def _round_up(x, m):
    return (x + m - 1) // m * m


def _vmem_limit_bytes():
    # ~half of physical VMEM per TensorCore (v5e/v6e: 128 MiB -> 64 MiB, v7x: 64 -> 32).
    try:
        cap = pltpu.get_tpu_info().vmem_capacity_bytes
        return int(max(32 * 1024 * 1024, min(cap // 2, 96 * 1024 * 1024)))
    except Exception:
        return 32 * 1024 * 1024


def _fold_bn(gamma, beta, mean, var, eps=1e-5):
    scale = gamma / jnp.sqrt(var + eps)
    return scale.astype(jnp.float32), (beta - mean * scale).astype(jnp.float32)


# ----------------------------------------------------------------------------
# Fused kernel body: conv1+BN1+ReLU+dropout -> conv2+BN2 -> (+shortcut) -> ReLU
# ----------------------------------------------------------------------------
def _make_fused_kernel(s, ho, wo, has_proj):
    m = ho * wo

    def kernel(*refs):
        if has_proj:
            xp_ref, w1_ref, b1_ref, w2_ref, wsc_ref, b2_ref, o_ref, o1_scr = refs
        else:
            xp_ref, w1_ref, b1_ref, w2_ref, b2_ref, o_ref, o1_scr = refs
            wsc_ref = None

        # ---- conv1 (BN1 scale + dropout mask folded into w1/b1) + ReLU; in-kernel im2col ----
        acc1 = None
        for t, (dy, dx) in enumerate(_TAPS):
            plane = (dy % s) * s + (dx % s)
            i0, j0 = dy // s, dx // s
            win = xp_ref[plane, i0:i0 + ho, j0:j0 + wo, :]            # (ho, wo, Cin_p)
            lhs = win.reshape(m, win.shape[-1]).astype(jnp.bfloat16)
            part = jnp.dot(lhs, w1_ref[t], preferred_element_type=jnp.float32)
            acc1 = part if acc1 is None else acc1 + part
        y1 = jnp.maximum(acc1 + b1_ref[...], 0.0)                     # (m, Cp_p) f32
        # (relu(z)*d == relu(z*d) holds because the dropout mask d >= 0.)

        # Stage-1 activation never leaves VMEM: zero-ring scratch provides conv2's padding=1.
        o1_scr[...] = jnp.zeros_like(o1_scr)
        o1_scr[1:ho + 1, 1:wo + 1, :] = (
            y1.reshape(ho, wo, y1.shape[-1]).astype(o1_scr.dtype))

        # ---- conv2 (BN2 scale folded into w2); in-kernel im2col over the VMEM scratch ----
        acc2 = None
        for t, (dy, dx) in enumerate(_TAPS):
            win = o1_scr[dy:dy + ho, dx:dx + wo, :]                   # (ho, wo, Cp_p) bf16
            part = jnp.dot(win.reshape(m, win.shape[-1]), w2_ref[t],
                           preferred_element_type=jnp.float32)
            acc2 = part if acc2 is None else acc2 + part

        # ---- shortcut: x[s*i, s*j] == x_pad[1 + s*i, 1 + s*j] -> parity plane (1%s, 1%s) ----
        ps, po = 1 % s, 1 // s
        win = xp_ref[ps * s + ps, po:po + ho, po:po + wo, :]          # (ho, wo, Cin_p)
        sc = win.reshape(m, win.shape[-1])
        if has_proj:                                                  # 1x1 conv + BN (folded)
            sc = jnp.dot(sc.astype(jnp.bfloat16), wsc_ref[...],
                         preferred_element_type=jnp.float32)
        else:                                                         # identity: add in x's precision
            sc = sc.astype(jnp.float32)

        # b2_ref already contains bn2_bias (+ shortcut-BN bias for the projection path).
        o_ref[...] = jnp.maximum(acc2 + sc + b2_ref[...], 0.0).astype(o_ref.dtype)

    return kernel


# ----------------------------------------------------------------------------
# pallas_call wrapper
# ----------------------------------------------------------------------------
def _fused_block_call(xp, w1, b1, w2, wsc, b2, *, stride, ho, wo):
    n, s2, hp, wp, cin_p = xp.shape
    cp_p = w1.shape[-1]
    m = ho * wo
    has_proj = wsc is not None

    in_specs = [
        pl.BlockSpec((None, s2, hp, wp, cin_p), lambda i: (i, 0, 0, 0, 0)),
        pl.BlockSpec((9, cin_p, cp_p), lambda i: (0, 0, 0)),
        pl.BlockSpec((1, cp_p), lambda i: (0, 0)),
        pl.BlockSpec((9, cp_p, cp_p), lambda i: (0, 0, 0)),
    ]
    args = [xp, w1, b1, w2]
    if has_proj:
        in_specs.append(pl.BlockSpec((cin_p, cp_p), lambda i: (0, 0)))
        args.append(wsc)
    in_specs.append(pl.BlockSpec((1, cp_p), lambda i: (0, 0)))
    args.append(b2)

    return pl.pallas_call(
        _make_fused_kernel(stride, ho, wo, has_proj),
        out_shape=jax.ShapeDtypeStruct((n, m, cp_p), jnp.bfloat16),
        grid=(n,),
        in_specs=in_specs,
        out_specs=pl.BlockSpec((None, m, cp_p), lambda i: (i, 0, 0)),
        scratch_shapes=[pltpu.VMEM((ho + 2, wo + 2, cp_p), jnp.bfloat16)],
        compiler_params=pltpu.CompilerParams(
            dimension_semantics=("parallel",),
            vmem_limit_bytes=_vmem_limit_bytes(),
        ),
    )(*args)


# ----------------------------------------------------------------------------
# Host-side glue: BN/dropout folding + parity-plane input prep (no im2col, no 9x blowup)
# ----------------------------------------------------------------------------
@functools.partial(jax.jit, static_argnums=(2,))
def dropout_basic_block_forward(x_nhwc, params, stride):
    n, h, w, cin = x_nhwc.shape
    cp = params["w1"].shape[-1]
    s = stride
    ho = (h + 2 - 3) // s + 1
    wo = (w + 2 - 3) // s + 1
    cin_p = _round_up(cin, _LANE)
    cp_p = _round_up(cp, _LANE)
    has_proj = (s != 1) or (cin != cp)

    # --- fold BN1 + (non-negative) dropout channel mask into conv1; BN2 into conv2 ---
    s1, b1 = _fold_bn(params["bn1_gamma"], params["bn1_beta"],
                      params["bn1_mean"], params["bn1_var"])
    d = params["drop_mask"].astype(jnp.float32)
    w1 = (params["w1"].astype(jnp.float32) * (s1 * d)).reshape(9, cin, cp)
    w1 = jnp.pad(w1, ((0, 0), (0, cin_p - cin), (0, cp_p - cp))).astype(jnp.bfloat16)
    b1v = jnp.pad((b1 * d).reshape(1, cp), ((0, 0), (0, cp_p - cp)))

    s2, b2 = _fold_bn(params["bn2_gamma"], params["bn2_beta"],
                      params["bn2_mean"], params["bn2_var"])
    w2 = (params["w2"].astype(jnp.float32) * s2).reshape(9, cp, cp)
    w2 = jnp.pad(w2, ((0, 0), (0, cp_p - cp), (0, cp_p - cp))).astype(jnp.bfloat16)

    if has_proj:
        ssc, bsc = _fold_bn(params["bnsc_gamma"], params["bnsc_beta"],
                            params["bnsc_mean"], params["bnsc_var"])
        wsc = params["wsc"].astype(jnp.float32).reshape(cin, cp) * ssc
        wsc = jnp.pad(wsc, ((0, cin_p - cin), (0, cp_p - cp))).astype(jnp.bfloat16)
        b2 = b2 + bsc                                    # fused conv2 + shortcut-BN bias
    else:
        wsc = None
    b2v = jnp.pad(b2.reshape(1, cp), ((0, 0), (0, cp_p - cp)))

    # --- input prep: one spatial(+1 ring)/channel pad + s*s parity-plane split ---
    hp, wp_ = 2 // s + ho, 2 // s + wo
    x_pad = jnp.pad(x_nhwc, ((0, 0), (1, 1), (1, 1), (0, cin_p - cin)))
    planes = []
    for a in range(s):
        for b in range(s):
            p_ = x_pad[:, a::s, b::s, :][:, :hp, :wp_, :]
            p_ = jnp.pad(p_, ((0, 0), (0, hp - p_.shape[1]),
                              (0, wp_ - p_.shape[2]), (0, 0)))
            planes.append(p_)
    xp = jnp.stack(planes, axis=1)                       # (N, s*s, hp, wp, Cin_p)

    out = _fused_block_call(xp, w1, b1v, w2, wsc, b2v, stride=s, ho=ho, wo=wo)
    return out[:, :, :cp].reshape(n, ho, wo, cp)         # (N, Ho, Wo, Cp) bf16


# ----------------------------------------------------------------------------
# Pure-JAX f32 reference (same semantics) for a correctness check
# ----------------------------------------------------------------------------
def _ref_forward(x_nhwc, params, stride):
    def conv(x, w, s, pad):
        return lax.conv_general_dilated(x, w, (s, s), pad,
                                        dimension_numbers=("NHWC", "HWIO", "NHWC"))

    def bn(x, g, b, m, v, eps=1e-5):
        return (x - m) / jnp.sqrt(v + eps) * g + b

    cin, cp = x_nhwc.shape[-1], params["w1"].shape[-1]
    y = conv(x_nhwc, params["w1"], stride, ((1, 1), (1, 1)))
    y = jnp.maximum(bn(y, params["bn1_gamma"], params["bn1_beta"],
                       params["bn1_mean"], params["bn1_var"]), 0.0)
    y = y * params["drop_mask"].reshape(1, 1, 1, cp)
    y = conv(y, params["w2"], 1, ((1, 1), (1, 1)))
    y = bn(y, params["bn2_gamma"], params["bn2_beta"],
           params["bn2_mean"], params["bn2_var"])
    if stride != 1 or cin != cp:
        sc = conv(x_nhwc, params["wsc"], stride, ((0, 0), (0, 0)))
        sc = bn(sc, params["bnsc_gamma"], params["bnsc_beta"],
                params["bnsc_mean"], params["bnsc_var"])
    else:
        sc = x_nhwc
    return jnp.maximum(y + sc, 0.0)


# ----------------------------------------------------------------------------
# Deterministic parameter construction + run
# ----------------------------------------------------------------------------
def _make_params(key, cin, cp, dropout_rate):
    ks = jax.random.split(key, 16)
    u = lambda k, shape: jax.random.uniform(k, shape, jnp.float32, 0.5, 1.5)
    nrm = lambda k, shape: 0.1 * jax.random.normal(k, shape, jnp.float32)
    keep = jax.random.bernoulli(ks[15], 1.0 - dropout_rate, (cp,)).astype(jnp.float32)
    return {
        "w1": nrm(ks[0], (3, 3, cin, cp)),
        "bn1_gamma": u(ks[1], (cp,)), "bn1_beta": nrm(ks[2], (cp,)),
        "bn1_mean": nrm(ks[3], (cp,)), "bn1_var": u(ks[4], (cp,)),
        "w2": nrm(ks[5], (3, 3, cp, cp)),
        "bn2_gamma": u(ks[6], (cp,)), "bn2_beta": nrm(ks[7], (cp,)),
        "bn2_mean": nrm(ks[8], (cp,)), "bn2_var": u(ks[9], (cp,)),
        "wsc": nrm(ks[10], (1, 1, cin, cp)),
        "bnsc_gamma": u(ks[11], (cp,)), "bnsc_beta": nrm(ks[12], (cp,)),
        "bnsc_mean": nrm(ks[13], (cp,)), "bnsc_var": u(ks[14], (cp,)),
        "drop_mask": keep / (1.0 - dropout_rate),
    }


if __name__ == "__main__":
    key = jax.random.PRNGKey(0)

    def run_case(n, cin, h, w, planes, stride, p_drop, case_key):
        k_x, k_p = jax.random.split(case_key)
        x_nchw = jax.random.normal(k_x, (n, cin, h, w), jnp.float32)   # PyTorch layout
        x_nhwc = jnp.transpose(x_nchw, (0, 2, 3, 1))                   # kernel layout
        params = _make_params(k_p, cin, planes, p_drop)

        out = jax.block_until_ready(dropout_basic_block_forward(x_nhwc, params, stride))
        ref = jax.block_until_ready(_ref_forward(x_nhwc, params, stride))
        # bf16 MXU operands + bf16 stage-1/output -> loosened tolerances vs f32 reference.
        np.testing.assert_allclose(np.asarray(out.astype(jnp.float32)),
                                   np.asarray(ref), rtol=5e-2, atol=1e-1)

        out_nchw = jnp.transpose(out, (0, 3, 1, 2))                    # back to NCHW
        assert out_nchw.shape == (n, planes, h // stride, w // stride)
        return out_nchw

    k_a, k_b = jax.random.split(key)
    run_case(2, 4, 16, 16, 8, 2, 0.25, k_a)   # projection-shortcut (downsampling) block
    run_case(2, 8, 16, 16, 8, 1, 0.25, k_b)   # identity-shortcut block
    print("KERNEL_OK")
</pallas_src>

<mosaic_0001>
module attributes {stable_mosaic.version = 11 : i64} {
  func.func @kernel(%arg0: i32, %arg1: memref<1x4x9x9x128xf32, #tpu.memory_space<vmem>>, %arg2: memref<9x128x128xbf16, #tpu.memory_space<vmem>>, %arg3: memref<1x128xf32, #tpu.memory_space<vmem>>, %arg4: memref<9x128x128xbf16, #tpu.memory_space<vmem>>, %arg5: memref<128x128xbf16, #tpu.memory_space<vmem>>, %arg6: memref<1x128xf32, #tpu.memory_space<vmem>>, %arg7: memref<1x64x128xbf16, #tpu.memory_space<vmem>>, %arg8: memref<10x10x128xbf16, #tpu.memory_space<vmem>>) attributes {dimension_semantics = [#tpu.dimension_semantics<parallel>], iteration_bounds = array<i64: 2>, scalar_prefetch = 0 : i64, scratch_operands = 1 : i64, tpu.core_type = #tpu.core_type<tc>, window_params = [{transform_indices = @transform_0, window_bounds = array<i64: 1, 4, 9, 9, 128>}, {pipeline_mode = #tpu.pipeline_mode<synchronous>, transform_indices = @transform_1, window_bounds = array<i64: 9, 128, 128>}, {pipeline_mode = #tpu.pipeline_mode<synchronous>, transform_indices = @transform_2, window_bounds = array<i64: 1, 128>}, {pipeline_mode = #tpu.pipeline_mode<synchronous>, transform_indices = @transform_3, window_bounds = array<i64: 9, 128, 128>}, {pipeline_mode = #tpu.pipeline_mode<synchronous>, transform_indices = @transform_4, window_bounds = array<i64: 128, 128>}, {pipeline_mode = #tpu.pipeline_mode<synchronous>, transform_indices = @transform_5, window_bounds = array<i64: 1, 128>}, {transform_indices = @transform_6, window_bounds = array<i64: 1, 64, 128>}]} {
    %c0 = arith.constant 0 : index
    %c0_0 = arith.constant 0 : index
    %c0_1 = arith.constant 0 : index
    %c0_2 = arith.constant 0 : index
    %c0_3 = arith.constant 0 : index
    %0 = vector.load %arg1[%c0, %c0_0, %c0_1, %c0_2, %c0_3] : memref<1x4x9x9x128xf32, #tpu.memory_space<vmem>>, vector<1x1x8x8x128xf32>
    %1 = vector.shape_cast %0 : vector<1x1x8x8x128xf32> to vector<8x8x128xf32>
    %2 = vector.shape_cast %1 : vector<8x8x128xf32> to vector<64x128xf32>
    %3 = arith.truncf %2 : vector<64x128xf32> to vector<64x128xbf16>
    %c0_4 = arith.constant 0 : index
    %c0_5 = arith.constant 0 : index
    %c0_6 = arith.constant 0 : index
    %4 = vector.load %arg2[%c0_4, %c0_5, %c0_6] : memref<9x128x128xbf16, #tpu.memory_space<vmem>>, vector<1x128x128xbf16>
    %5 = vector.shape_cast %4 : vector<1x128x128xbf16> to vector<128x128xbf16>
    %cst = arith.constant dense<0.000000e+00> : vector<64x128xf32>
    %6 = tpu.matmul %3, %5, %cst {dimension_numbers = #tpu.dot_dimension_numbers<[1], [0], [0], [1], [0, 0, 1, 1], [], []>} : vector<64x128xbf16>, vector<128x128xbf16>, vector<64x128xf32> -> vector<64x128xf32>
    %c0_7 = arith.constant 0 : index
    %c1 = arith.constant 1 : index
    %c0_8 = arith.constant 0 : index
    %c0_9 = arith.constant 0 : index
    %c0_10 = arith.constant 0 : index
    %7 = vector.load %arg1[%c0_7, %c1, %c0_8, %c0_9, %c0_10] : memref<1x4x9x9x128xf32, #tpu.memory_space<vmem>>, vector<1x1x8x8x128xf32>
    %8 = vector.shape_cast %7 : vector<1x1x8x8x128xf32> to vector<8x8x128xf32>
    %9 = vector.shape_cast %8 : vector<8x8x128xf32> to vector<64x128xf32>
    %10 = arith.truncf %9 : vector<64x128xf32> to vector<64x128xbf16>
    %c1_11 = arith.constant 1 : index
    %c0_12 = arith.constant 0 : index
    %c0_13 = arith.constant 0 : index
    %11 = vector.load %arg2[%c1_11, %c0_12, %c0_13] : memref<9x128x128xbf16, #tpu.memory_space<vmem>>, vector<1x128x128xbf16>
    %12 = vector.shape_cast %11 : vector<1x128x128xbf16> to vector<128x128xbf16>
    %cst_14 = arith.constant dense<0.000000e+00> : vector<64x128xf32>
    %13 = tpu.matmul %10, %12, %cst_14 {dimension_numbers = #tpu.dot_dimension_numbers<[1], [0], [0], [1], [0, 0, 1, 1], [], []>} : vector<64x128xbf16>, vector<128x128xbf16>, vector<64x128xf32> -> vector<64x128xf32>
    %14 = arith.addf %6, %13 : vector<64x128xf32>
    %c0_15 = arith.constant 0 : index
    %c0_16 = arith.constant 0 : index
    %c0_17 = arith.constant 0 : index
    %c1_18 = arith.constant 1 : index
    %c0_19 = arith.constant 0 : index
    %15 = vector.load %arg1[%c0_15, %c0_16, %c0_17, %c1_18, %c0_19] : memref<1x4x9x9x128xf32, #tpu.memory_space<vmem>>, vector<1x1x8x8x128xf32>
    %16 = vector.shape_cast %15 : vector<1x1x8x8x128xf32> to vector<8x8x128xf32>
    %17 = vector.shape_cast %16 : vector<8x8x128xf32> to vector<64x128xf32>
    %18 = arith.truncf %17 : vector<64x128xf32> to vector<64x128xbf16>
    %c2 = arith.constant 2 : index
    %c0_20 = arith.constant 0 : index
    %c0_21 = arith.constant 0 : index
    %19 = vector.load %arg2[%c2, %c0_20, %c0_21] : memref<9x128x128xbf16, #tpu.memory_space<vmem>>, vector<1x128x128xbf16>
    %20 = vector.shape_cast %19 : vector<1x128x128xbf16> to vector<128x128xbf16>
    %cst_22 = arith.constant dense<0.000000e+00> : vector<64x128xf32>
    %21 = tpu.matmul %18, %20, %cst_22 {dimension_numbers = #tpu.dot_dimension_numbers<[1], [0], [0], [1], [0, 0, 1, 1], [], []>} : vector<64x128xbf16>, vector<128x128xbf16>, vector<64x128xf32> -> vector<64x128xf32>
    %22 = arith.addf %14, %21 : vector<64x128xf32>
    %c0_23 = arith.constant 0 : index
    %c2_24 = arith.constant 2 : index
    %c0_25 = arith.constant 0 : index
    %c0_26 = arith.constant 0 : index
    %c0_27 = arith.constant 0 : index
    %23 = vector.load %arg1[%c0_23, %c2_24, %c0_25, %c0_26, %c0_27] : memref<1x4x9x9x128xf32, #tpu.memory_space<vmem>>, vector<1x1x8x8x128xf32>
    %24 = vector.shape_cast %23 : vector<1x1x8x8x128xf32> to vector<8x8x128xf32>
    %25 = vector.shape_cast %24 : vector<8x8x128xf32> to vector<64x128xf32>
    %26 = arith.truncf %25 : vector<64x128xf32> to vector<64x128xbf16>
    %c3 = arith.constant 3 : index
    %c0_28 = arith.constant 0 : index
    %c0_29 = arith.constant 0 : index
    %27 = vector.load %arg2[%c3, %c0_28, %c0_29] : memref<9x128x128xbf16, #tpu.memory_space<vmem>>, vector<1x128x128xbf16>
    %28 = vector.shape_cast %27 : vector<1x128x128xbf16> to vector<128x128xbf16>
    %cst_30 = arith.constant dense<0.000000e+00> : vector<64x128xf32>
    %29 = tpu.matmul %26, %28, %cst_30 {dimension_numbers = #tpu.dot_dimension_numbers<[1], [0], [0], [1], [0, 0, 1, 1], [], []>} : vector<64x128xbf16>, vector<128x128xbf16>, vector<64x128xf32> -> vector<64x128xf32>
    %30 = arith.addf %22, %29 : vector<64x128xf32>
    %c0_31 = arith.constant 0 : index
    %c3_32 = arith.constant 3 : index
    %c0_33 = arith.constant 0 : index
    %c0_34 = arith.constant 0 : index
    %c0_35 = arith.constant 0 : index
    %31 = vector.load %arg1[%c0_31, %c3_32, %c0_33, %c0_34, %c0_35] : memref<1x4x9x9x128xf32, #tpu.memory_space<vmem>>, vector<1x1x8x8x128xf32>
    %32 = vector.shape_cast %31 : vector<1x1x8x8x128xf32> to vector<8x8x128xf32>
    %33 = vector.shape_cast %32 : vector<8x8x128xf32> to vector<64x128xf32>
    %34 = arith.truncf %33 : vector<64x128xf32> to vector<64x128xbf16>
    %c4 = arith.constant 4 : index
    %c0_36 = arith.constant 0 : index
    %c0_37 = arith.constant 0 : index
    %35 = vector.load %arg2[%c4, %c0_36, %c0_37] : memref<9x128x128xbf16, #tpu.memory_space<vmem>>, vector<1x128x128xbf16>
    %36 = vector.shape_cast %35 : vector<1x128x128xbf16> to vector<128x128xbf16>
    %cst_38 = arith.constant dense<0.000000e+00> : vector<64x128xf32>
    %37 = tpu.matmul %34, %36, %cst_38 {dimension_numbers = #tpu.dot_dimension_numbers<[1], [0], [0], [1], [0, 0, 1, 1], [], []>} : vector<64x128xbf16>, vector<128x128xbf16>, vector<64x128xf32> -> vector<64x128xf32>
    %38 = arith.addf %30, %37 : vector<64x128xf32>
    %c0_39 = arith.constant 0 : index
    %c2_40 = arith.constant 2 : index
    %c0_41 = arith.constant 0 : index
    %c1_42 = arith.constant 1 : index
    %c0_43 = arith.constant 0 : index
    %39 = vector.load %arg1[%c0_39, %c2_40, %c0_41, %c1_42, %c0_43] : memref<1x4x9x9x128xf32, #tpu.memory_space<vmem>>, vector<1x1x8x8x128xf32>
    %40 = vector.shape_cast %39 : vector<1x1x8x8x128xf32> to vector<8x8x128xf32>
    %41 = vector.shape_cast %40 : vector<8x8x128xf32> to vector<64x128xf32>
    %42 = arith.truncf %41 : vector<64x128xf32> to vector<64x128xbf16>
    %c5 = arith.constant 5 : index
    %c0_44 = arith.constant 0 : index
    %c0_45 = arith.constant 0 : index
    %43 = vector.load %arg2[%c5, %c0_44, %c0_45] : memref<9x128x128xbf16, #tpu.memory_space<vmem>>, vector<1x128x128xbf16>
    %44 = vector.shape_cast %43 : vector<1x128x128xbf16> to vector<128x128xbf16>
    %cst_46 = arith.constant dense<0.000000e+00> : vector<64x128xf32>
    %45 = tpu.matmul %42, %44, %cst_46 {dimension_numbers = #tpu.dot_dimension_numbers<[1], [0], [0], [1], [0, 0, 1, 1], [], []>} : vector<64x128xbf16>, vector<128x128xbf16>, vector<64x128xf32> -> vector<64x128xf32>
    %46 = arith.addf %38, %45 : vector<64x128xf32>
    %c0_47 = arith.constant 0 : index
    %c0_48 = arith.constant 0 : index
    %c1_49 = arith.constant 1 : index
    %c0_50 = arith.constant 0 : index
    %c0_51 = arith.constant 0 : index
    %47 = vector.load %arg1[%c0_47, %c0_48, %c1_49, %c0_50, %c0_51] : memref<1x4x9x9x128xf32, #tpu.memory_space<vmem>>, vector<1x1x8x8x128xf32>
    %48 = vector.shape_cast %47 : vector<1x1x8x8x128xf32> to vector<8x8x128xf32>
    %49 = vector.shape_cast %48 : vector<8x8x128xf32> to vector<64x128xf32>
    %50 = arith.truncf %49 : vector<64x128xf32> to vector<64x128xbf16>
    %c6 = arith.constant 6 : index
    %c0_52 = arith.constant 0 : index
    %c0_53 = arith.constant 0 : index
    %51 = vector.load %arg2[%c6, %c0_52, %c0_53] : memref<9x128x128xbf16, #tpu.memory_space<vmem>>, vector<1x128x128xbf16>
    %52 = vector.shape_cast %51 : vector<1x128x128xbf16> to vector<128x128xbf16>
    %cst_54 = arith.constant dense<0.000000e+00> : vector<64x128xf32>
    %53 = tpu.matmul %50, %52, %cst_54 {dimension_numbers = #tpu.dot_dimension_numbers<[1], [0], [0], [1], [0, 0, 1, 1], [], []>} : vector<64x128xbf16>, vector<128x128xbf16>, vector<64x128xf32> -> vector<64x128xf32>
    %54 = arith.addf %46, %53 : vector<64x128xf32>
    %c0_55 = arith.constant 0 : index
    %c1_56 = arith.constant 1 : index
    %c1_57 = arith.constant 1 : index
    %c0_58 = arith.constant 0 : index
    %c0_59 = arith.constant 0 : index
    %55 = vector.load %arg1[%c0_55, %c1_56, %c1_57, %c0_58, %c0_59] : memref<1x4x9x9x128xf32, #tpu.memory_space<vmem>>, vector<1x1x8x8x128xf32>
    %56 = vector.shape_cast %55 : vector<1x1x8x8x128xf32> to vector<8x8x128xf32>
    %57 = vector.shape_cast %56 : vector<8x8x128xf32> to vector<64x128xf32>
    %58 = arith.truncf %57 : vector<64x128xf32> to vector<64x128xbf16>
    %c7 = arith.constant 7 : index
    %c0_60 = arith.constant 0 : index
    %c0_61 = arith.constant 0 : index
    %59 = vector.load %arg2[%c7, %c0_60, %c0_61] : memref<9x128x128xbf16, #tpu.memory_space<vmem>>, vector<1x128x128xbf16>
    %60 = vector.shape_cast %59 : vector<1x128x128xbf16> to vector<128x128xbf16>
    %cst_62 = arith.constant dense<0.000000e+00> : vector<64x128xf32>
    %61 = tpu.matmul %58, %60, %cst_62 {dimension_numbers = #tpu.dot_dimension_numbers<[1], [0], [0], [1], [0, 0, 1, 1], [], []>} : vector<64x128xbf16>, vector<128x128xbf16>, vector<64x128xf32> -> vector<64x128xf32>
    %62 = arith.addf %54, %61 : vector<64x128xf32>
    %c0_63 = arith.constant 0 : index
    %c0_64 = arith.constant 0 : index
    %c1_65 = arith.constant 1 : index
    %c1_66 = arith.constant 1 : index
    %c0_67 = arith.constant 0 : index
    %63 = vector.load %arg1[%c0_63, %c0_64, %c1_65, %c1_66, %c0_67] : memref<1x4x9x9x128xf32, #tpu.memory_space<vmem>>, vector<1x1x8x8x128xf32>
    %64 = vector.shape_cast %63 : vector<1x1x8x8x128xf32> to vector<8x8x128xf32>
    %65 = vector.shape_cast %64 : vector<8x8x128xf32> to vector<64x128xf32>
    %66 = arith.truncf %65 : vector<64x128xf32> to vector<64x128xbf16>
    %c8 = arith.constant 8 : index
    %c0_68 = arith.constant 0 : index
    %c0_69 = arith.constant 0 : index
    %67 = vector.load %arg2[%c8, %c0_68, %c0_69] : memref<9x128x128xbf16, #tpu.memory_space<vmem>>, vector<1x128x128xbf16>
    %68 = vector.shape_cast %67 : vector<1x128x128xbf16> to vector<128x128xbf16>
    %cst_70 = arith.constant dense<0.000000e+00> : vector<64x128xf32>
    %69 = tpu.matmul %66, %68, %cst_70 {dimension_numbers = #tpu.dot_dimension_numbers<[1], [0], [0], [1], [0, 0, 1, 1], [], []>} : vector<64x128xbf16>, vector<128x128xbf16>, vector<64x128xf32> -> vector<64x128xf32>
    %70 = arith.addf %62, %69 : vector<64x128xf32>
    %c0_71 = arith.constant 0 : index
    %c0_72 = arith.constant 0 : index
    %71 = vector.load %arg3[%c0_71, %c0_72] : memref<1x128xf32, #tpu.memory_space<vmem>>, vector<1x128xf32>
    %72 = vector.broadcast %71 : vector<1x128xf32> to vector<64x128xf32>
    %73 = arith.addf %70, %72 : vector<64x128xf32>
    %cst_73 = arith.constant 0.000000e+00 : f32
    %74 = vector.broadcast %cst_73 : f32 to vector<64x128xf32>
    %75 = arith.maximumf %73, %74 : vector<64x128xf32>
    %cst_74 = arith.constant 0.000000e+00 : bf16
    %76 = vector.broadcast %cst_74 : bf16 to vector<10x10x128xbf16>
    %c0_75 = arith.constant 0 : index
    %c0_76 = arith.constant 0 : index
    %c0_77 = arith.constant 0 : index
    %77 = vector.load %arg8[%c0_75, %c0_76, %c0_77] : memref<10x10x128xbf16, #tpu.memory_space<vmem>>, vector<10x10x128xbf16>
    tpu.vector_store %arg8[%c0_75, %c0_76, %c0_77], %76 {strides = array<i32>} : memref<10x10x128xbf16, #tpu.memory_space<vmem>>, vector<10x10x128xbf16>,
    %78 = vector.shape_cast %75 : vector<64x128xf32> to vector<8x8x128xf32>
    %79 = arith.truncf %78 : vector<8x8x128xf32> to vector<8x8x128xbf16>
    %c1_78 = arith.constant 1 : index
    %c1_79 = arith.constant 1 : index
    %c0_80 = arith.constant 0 : index
    %80 = vector.load %arg8[%c1_78, %c1_79, %c0_80] : memref<10x10x128xbf16, #tpu.memory_space<vmem>>, vector<8x8x128xbf16>
    tpu.vector_store %arg8[%c1_78, %c1_79, %c0_80], %79 {strides = array<i32>} : memref<10x10x128xbf16, #tpu.memory_space<vmem>>, vector<8x8x128xbf16>,
    %c0_81 = arith.constant 0 : index
    %c0_82 = arith.constant 0 : index
    %c0_83 = arith.constant 0 : index
    %81 = vector.load %arg8[%c0_81, %c0_82, %c0_83] : memref<10x10x128xbf16, #tpu.memory_space<vmem>>, vector<8x8x128xbf16>
    %82 = vector.shape_cast %81 : vector<8x8x128xbf16> to vector<64x128xbf16>
    %c0_84 = arith.constant 0 : index
    %c0_85 = arith.constant 0 : index
    %c0_86 = arith.constant 0 : index
    %83 = vector.load %arg4[%c0_84, %c0_85, %c0_86] : memref<9x128x128xbf16, #tpu.memory_space<vmem>>, vector<1x128x128xbf16>
    %84 = vector.shape_cast %83 : vector<1x128x128xbf16> to vector<128x128xbf16>
    %cst_87 = arith.constant dense<0.000000e+00> : vector<64x128xf32>
    %85 = tpu.matmul %82, %84, %cst_87 {dimension_numbers = #tpu.dot_dimension_numbers<[1], [0], [0], [1], [0, 0, 1, 1], [], []>} : vector<64x128xbf16>, vector<128x128xbf16>, vector<64x128xf32> -> vector<64x128xf32>
    %c0_88 = arith.constant 0 : index
    %c1_89 = arith.constant 1 : index
    %c0_90 = arith.constant 0 : index
    %86 = vector.load %arg8[%c0_88, %c1_89, %c0_90] : memref<10x10x128xbf16, #tpu.memory_space<vmem>>, vector<8x8x128xbf16>
    %87 = vector.shape_cast %86 : vector<8x8x128xbf16> to vector<64x128xbf16>
    %c1_91 = arith.constant 1 : index
    %c0_92 = arith.constant 0 : index
    %c0_93 = arith.constant 0 : index
    %88 = vector.load %arg4[%c1_91, %c0_92, %c0_93] : memref<9x128x128xbf16, #tpu.memory_space<vmem>>, vector<1x128x128xbf16>
    %89 = vector.shape_cast %88 : vector<1x128x128xbf16> to vector<128x128xbf16>
    %cst_94 = arith.constant dense<0.000000e+00> : vector<64x128xf32>
    %90 = tpu.matmul %87, %89, %cst_94 {dimension_numbers = #tpu.dot_dimension_numbers<[1], [0], [0], [1], [0, 0, 1, 1], [], []>} : vector<64x128xbf16>, vector<128x128xbf16>, vector<64x128xf32> -> vector<64x128xf32>
    %91 = arith.addf %85, %90 : vector<64x128xf32>
    %c0_95 = arith.constant 0 : index
    %c2_96 = arith.constant 2 : index
    %c0_97 = arith.constant 0 : index
    %92 = vector.load %arg8[%c0_95, %c2_96, %c0_97] : memref<10x10x128xbf16, #tpu.memory_space<vmem>>, vector<8x8x128xbf16>
    %93 = vector.shape_cast %92 : vector<8x8x128xbf16> to vector<64x128xbf16>
    %c2_98 = arith.constant 2 : index
    %c0_99 = arith.constant 0 : index
    %c0_100 = arith.constant 0 : index
    %94 = vector.load %arg4[%c2_98, %c0_99, %c0_100] : memref<9x128x128xbf16, #tpu.memory_space<vmem>>, vector<1x128x128xbf16>
    %95 = vector.shape_cast %94 : vector<1x128x128xbf16> to vector<128x128xbf16>
    %cst_101 = arith.constant dense<0.000000e+00> : vector<64x128xf32>
    %96 = tpu.matmul %93, %95, %cst_101 {dimension_numbers = #tpu.dot_dimension_numbers<[1], [0], [0], [1], [0, 0, 1, 1], [], []>} : vector<64x128xbf16>, vector<128x128xbf16>, vector<64x128xf32> -> vector<64x128xf32>
    %97 = arith.addf %91, %96 : vector<64x128xf32>
    %c1_102 = arith.constant 1 : index
    %c0_103 = arith.constant 0 : index
    %c0_104 = arith.constant 0 : index
    %98 = vector.load %arg8[%c1_102, %c0_103, %c0_104] : memref<10x10x128xbf16, #tpu.memory_space<vmem>>, vector<8x8x128xbf16>
    %99 = vector.shape_cast %98 : vector<8x8x128xbf16> to vector<64x128xbf16>
    %c3_105 = arith.constant 3 : index
    %c0_106 = arith.constant 0 : index
    %c0_107 = arith.constant 0 : index
    %100 = vector.load %arg4[%c3_105, %c0_106, %c0_107] : memref<9x128x128xbf16, #tpu.memory_space<vmem>>, vector<1x128x128xbf16>
    %101 = vector.shape_cast %100 : vector<1x128x128xbf16> to vector<128x128xbf16>
    %cst_108 = arith.constant dense<0.000000e+00> : vector<64x128xf32>
    %102 = tpu.matmul %99, %101, %cst_108 {dimension_numbers = #tpu.dot_dimension_numbers<[1], [0], [0], [1], [0, 0, 1, 1], [], []>} : vector<64x128xbf16>, vector<128x128xbf16>, vector<64x128xf32> -> vector<64x128xf32>
    %103 = arith.addf %97, %102 : vector<64x128xf32>
    %c1_109 = arith.constant 1 : index
    %c1_110 = arith.constant 1 : index
    %c0_111 = arith.constant 0 : index
    %104 = vector.load %arg8[%c1_109, %c1_110, %c0_111] : memref<10x10x128xbf16, #tpu.memory_space<vmem>>, vector<8x8x128xbf16>
    %105 = vector.shape_cast %104 : vector<8x8x128xbf16> to vector<64x128xbf16>
    %c4_112 = arith.constant 4 : index
    %c0_113 = arith.constant 0 : index
    %c0_114 = arith.constant 0 : index
    %106 = vector.load %arg4[%c4_112, %c0_113, %c0_114] : memref<9x128x128xbf16, #tpu.memory_space<vmem>>, vector<1x128x128xbf16>
    %107 = vector.shape_cast %106 : vector<1x128x128xbf16> to vector<128x128xbf16>
    %cst_115 = arith.constant dense<0.000000e+00> : vector<64x128xf32>
    %108 = tpu.matmul %105, %107, %cst_115 {dimension_numbers = #tpu.dot_dimension_numbers<[1], [0], [0], [1], [0, 0, 1, 1], [], []>} : vector<64x128xbf16>, vector<128x128xbf16>, vector<64x128xf32> -> vector<64x128xf32>
    %109 = arith.addf %103, %108 : vector<64x128xf32>
    %c1_116 = arith.constant 1 : index
    %c2_117 = arith.constant 2 : index
    %c0_118 = arith.constant 0 : index
    %110 = vector.load %arg8[%c1_116, %c2_117, %c0_118] : memref<10x10x128xbf16, #tpu.memory_space<vmem>>, vector<8x8x128xbf16>
    %111 = vector.shape_cast %110 : vector<8x8x128xbf16> to vector<64x128xbf16>
    %c5_119 = arith.constant 5 : index
    %c0_120 = arith.constant 0 : index
    %c0_121 = arith.constant 0 : index
    %112 = vector.load %arg4[%c5_119, %c0_120, %c0_121] : memref<9x128x128xbf16, #tpu.memory_space<vmem>>, vector<1x128x128xbf16>
    %113 = vector.shape_cast %112 : vector<1x128x128xbf16> to vector<128x128xbf16>
    %cst_122 = arith.constant dense<0.000000e+00> : vector<64x128xf32>
    %114 = tpu.matmul %111, %113, %cst_122 {dimension_numbers = #tpu.dot_dimension_numbers<[1], [0], [0], [1], [0, 0, 1, 1], [], []>} : vector<64x128xbf16>, vector<128x128xbf16>, vector<64x128xf32> -> vector<64x128xf32>
    %115 = arith.addf %109, %114 : vector<64x128xf32>
    %c2_123 = arith.constant 2 : index
    %c0_124 = arith.constant 0 : index
    %c0_125 = arith.constant 0 : index
    %116 = vector.load %arg8[%c2_123, %c0_124, %c0_125] : memref<10x10x128xbf16, #tpu.memory_space<vmem>>, vector<8x8x128xbf16>
    %117 = vector.shape_cast %116 : vector<8x8x128xbf16> to vector<64x128xbf16>
    %c6_126 = arith.constant 6 : index
    %c0_127 = arith.constant 0 : index
    %c0_128 = arith.constant 0 : index
    %118 = vector.load %arg4[%c6_126, %c0_127, %c0_128] : memref<9x128x128xbf16, #tpu.memory_space<vmem>>, vector<1x128x128xbf16>
    %119 = vector.shape_cast %118 : vector<1x128x128xbf16> to vector<128x128xbf16>
    %cst_129 = arith.constant dense<0.000000e+00> : vector<64x128xf32>
    %120 = tpu.matmul %117, %119, %cst_129 {dimension_numbers = #tpu.dot_dimension_numbers<[1], [0], [0], [1], [0, 0, 1, 1], [], []>} : vector<64x128xbf16>, vector<128x128xbf16>, vector<64x128xf32> -> vector<64x128xf32>
    %121 = arith.addf %115, %120 : vector<64x128xf32>
    %c2_130 = arith.constant 2 : index
    %c1_131 = arith.constant 1 : index
    %c0_132 = arith.constant 0 : index
    %122 = vector.load %arg8[%c2_130, %c1_131, %c0_132] : memref<10x10x128xbf16, #tpu.memory_space<vmem>>, vector<8x8x128xbf16>
    %123 = vector.shape_cast %122 : vector<8x8x128xbf16> to vector<64x128xbf16>
    %c7_133 = arith.constant 7 : index
    %c0_134 = arith.constant 0 : index
    %c0_135 = arith.constant 0 : index
    %124 = vector.load %arg4[%c7_133, %c0_134, %c0_135] : memref<9x128x128xbf16, #tpu.memory_space<vmem>>, vector<1x128x128xbf16>
    %125 = vector.shape_cast %124 : vector<1x128x128xbf16> to vector<128x128xbf16>
    %cst_136 = arith.constant dense<0.000000e+00> : vector<64x128xf32>
    %126 = tpu.matmul %123, %125, %cst_136 {dimension_numbers = #tpu.dot_dimension_numbers<[1], [0], [0], [1], [0, 0, 1, 1], [], []>} : vector<64x128xbf16>, vector<128x128xbf16>, vector<64x128xf32> -> vector<64x128xf32>
    %127 = arith.addf %121, %126 : vector<64x128xf32>
    %c2_137 = arith.constant 2 : index
    %c2_138 = arith.constant 2 : index
    %c0_139 = arith.constant 0 : index
    %128 = vector.load %arg8[%c2_137, %c2_138, %c0_139] : memref<10x10x128xbf16, #tpu.memory_space<vmem>>, vector<8x8x128xbf16>
    %129 = vector.shape_cast %128 : vector<8x8x128xbf16> to vector<64x128xbf16>
    %c8_140 = arith.constant 8 : index
    %c0_141 = arith.constant 0 : index
    %c0_142 = arith.constant 0 : index
    %130 = vector.load %arg4[%c8_140, %c0_141, %c0_142] : memref<9x128x128xbf16, #tpu.memory_space<vmem>>, vector<1x128x128xbf16>
    %131 = vector.shape_cast %130 : vector<1x128x128xbf16> to vector<128x128xbf16>
    %cst_143 = arith.constant dense<0.000000e+00> : vector<64x128xf32>
    %132 = tpu.matmul %129, %131, %cst_143 {dimension_numbers = #tpu.dot_dimension_numbers<[1], [0], [0], [1], [0, 0, 1, 1], [], []>} : vector<64x128xbf16>, vector<128x128xbf16>, vector<64x128xf32> -> vector<64x128xf32>
    %133 = arith.addf %127, %132 : vector<64x128xf32>
    %c0_144 = arith.constant 0 : index
    %c3_145 = arith.constant 3 : index
    %c0_146 = arith.constant 0 : index
    %c0_147 = arith.constant 0 : index
    %c0_148 = arith.constant 0 : index
    %134 = vector.load %arg1[%c0_144, %c3_145, %c0_146, %c0_147, %c0_148] : memref<1x4x9x9x128xf32, #tpu.memory_space<vmem>>, vector<1x1x8x8x128xf32>
    %135 = vector.shape_cast %134 : vector<1x1x8x8x128xf32> to vector<8x8x128xf32>
    %136 = vector.shape_cast %135 : vector<8x8x128xf32> to vector<64x128xf32>
    %137 = arith.truncf %136 : vector<64x128xf32> to vector<64x128xbf16>
    %c0_149 = arith.constant 0 : index
    %c0_150 = arith.constant 0 : index
    %138 = vector.load %arg5[%c0_149, %c0_150] : memref<128x128xbf16, #tpu.memory_space<vmem>>, vector<128x128xbf16>
    %cst_151 = arith.constant dense<0.000000e+00> : vector<64x128xf32>
    %139 = tpu.matmul %137, %138, %cst_151 {dimension_numbers = #tpu.dot_dimension_numbers<[1], [0], [0], [1], [0, 0, 1, 1], [], []>} : vector<64x128xbf16>, vector<128x128xbf16>, vector<64x128xf32> -> vector<64x128xf32>
    %140 = arith.addf %133, %139 : vector<64x128xf32>
    %c0_152 = arith.constant 0 : index
    %c0_153 = arith.constant 0 : index
    %141 = vector.load %arg6[%c0_152, %c0_153] : memref<1x128xf32, #tpu.memory_space<vmem>>, vector<1x128xf32>
    %142 = vector.broadcast %141 : vector<1x128xf32> to vector<64x128xf32>
    %143 = arith.addf %140, %142 : vector<64x128xf32>
    %cst_154 = arith.constant 0.000000e+00 : f32
    %144 = vector.broadcast %cst_154 : f32 to vector<64x128xf32>
    %145 = arith.maximumf %143, %144 : vector<64x128xf32>
    %146 = arith.truncf %145 : vector<64x128xf32> to vector<64x128xbf16>
    %c0_155 = arith.constant 0 : index
    %c0_156 = arith.constant 0 : index
    %c0_157 = arith.constant 0 : index
    %147 = vector.load %arg7[%c0_155, %c0_156, %c0_157] : memref<1x64x128xbf16, #tpu.memory_space<vmem>>, vector<1x64x128xbf16>
    %148 = vector.shape_cast %147 : vector<1x64x128xbf16> to vector<64x128xbf16>
    %149 = vector.shape_cast %146 : vector<64x128xbf16> to vector<1x64x128xbf16>
    tpu.vector_store %arg7[%c0_155, %c0_156, %c0_157], %149 {strides = array<i32>} : memref<1x64x128xbf16, #tpu.memory_space<vmem>>, vector<1x64x128xbf16>,
    return
  }
  func.func @transform_0(%arg0: i32) -> (i32, i32, i32, i32, i32) {
    %c0_i32 = arith.constant 0 : i32
    %c0_i32_0 = arith.constant 0 : i32
    %c0_i32_1 = arith.constant 0 : i32
    %c0_i32_2 = arith.constant 0 : i32
    %c0_i32_3 = arith.constant 0 : i32
    return %arg0, %c0_i32, %c0_i32_0, %c0_i32_1, %c0_i32_2 : i32, i32, i32, i32, i32
  }
  func.func @transform_1(%arg0: i32) -> (i32, i32, i32) {
    %c0_i32 = arith.constant 0 : i32
    %c0_i32_0 = arith.constant 0 : i32
    %c0_i32_1 = arith.constant 0 : i32
    %c0_i32_2 = arith.constant 0 : i32
    return %c0_i32, %c0_i32_0, %c0_i32_1 : i32, i32, i32
  }
  func.func @transform_2(%arg0: i32) -> (i32, i32) {
    %c0_i32 = arith.constant 0 : i32
    %c0_i32_0 = arith.constant 0 : i32
    %c0_i32_1 = arith.constant 0 : i32
    return %c0_i32, %c0_i32_0 : i32, i32
  }
  func.func @transform_3(%arg0: i32) -> (i32, i32, i32) {
    %c0_i32 = arith.constant 0 : i32
    %c0_i32_0 = arith.constant 0 : i32
    %c0_i32_1 = arith.constant 0 : i32
    %c0_i32_2 = arith.constant 0 : i32
    return %c0_i32, %c0_i32_0, %c0_i32_1 : i32, i32, i32
  }
  func.func @transform_4(%arg0: i32) -> (i32, i32) {
    %c0_i32 = arith.constant 0 : i32
    %c0_i32_0 = arith.constant 0 : i32
    %c0_i32_1 = arith.constant 0 : i32
    return %c0_i32, %c0_i32_0 : i32, i32
  }
  func.func @transform_5(%arg0: i32) -> (i32, i32) {
    %c0_i32 = arith.constant 0 : i32
    %c0_i32_0 = arith.constant 0 : i32
    %c0_i32_1 = arith.constant 0 : i32
    return %c0_i32, %c0_i32_0 : i32, i32
  }
  func.func @transform_6(%arg0: i32) -> (i32, i32, i32) {
    %c0_i32 = arith.constant 0 : i32
    %c0_i32_0 = arith.constant 0 : i32
    %c0_i32_1 = arith.constant 0 : i32
    return %arg0, %c0_i32, %c0_i32_0 : i32, i32, i32
  }
}

</mosaic_0001>

<bundles_post_ra>
// kernel: dropout_basic_block_forward.1
= control target key start
LH: loop header
LB: loop body
LE: loop exit
PB: predicated region body
PF: predicated region fallthrough
CT: control target
= control target key end

     0   :  { %s5696_s21 = smov 0   ;;  %s6677_s0 = inlined_call_operand.vmem [shape: f32[2,4,9,9,128], index: 0, kind: input, shape index: {}]   ;;  %s6678_s1 = inlined_call_operand.vmem [shape: bf16[9,128,128], index: 1, kind: input, shape index: {}]   ;;  %s6679_s2 = inlined_call_operand.vmem [shape: f32[1,128], index: 2, kind: input, shape index: {}]   ;;  %s6680_s3 = inlined_call_operand.vmem [shape: bf16[9,128,128], index: 3, kind: input, shape index: {}]   ;;  %s6681_s4 = inlined_call_operand.vmem [shape: bf16[128,128], index: 4, kind: input, shape index: {}]   ;;  %s6682_s5 = inlined_call_operand.vmem [shape: f32[1,128], index: 5, kind: input, shape index: {}]   ;;  %s6683_s6 = inlined_call_operand.vmem [shape: bf16[2,64,128], index: 6, kind: output, shape index: {}]  }
   0x1 LB: > { %s4036_s22 = sadd.s32 4294967295, %s5658_s21   ;;  %p4040_p0 = scmp.ge.s32.totalorder %s5658_s21, 1  ;;  %s5658_s21 = sphi %s5696_s21, %s16_s21  }
   0x2   : > { %p212_p1 = scmp.lt.s32.totalorder %s5658_s21, 3 }
   0x4   : > { %p213_p2 = pnand %p4040_p0, %p212_p1 }
   0x5   : > { %v5482_v0 = vld [vmem:[%s6678_s1 + $0x40] sm:$0xff] (!%p213_p2)   ;;  %p242_p3 = scmp.lt.s32.totalorder (!%p213_p2), %s4036_s22, 1  ;;  %v5483_v1 = vld [vmem:[%s6678_s1 + $0x48] sm:$0xff] (!%p213_p2)   ;;  %v5484_v2 = vld [vmem:[%s6678_s1 + $0x50] sm:$0xff] (!%p213_p2)   ;;  %vm1747_vm0 = vcmask (!%p213_p2), 1043456   ;;  %vm1753_vm2 = vcmask (!%p213_p2), 1040384  }
   0x6   : > { %216 = sbr.rel (%p213_p2) target bundleno = 1057 (0x421), region = 44  ;;  %4864 = vmatprep.subr.bf16.mxu0 (!%p213_p2), %v5482_v0  ;;  %v5485_v3 = vld [vmem:[%s6678_s1 + $0x58] sm:$0xff] (!%p213_p2)   ;;  %v5486_v7 = vld [vmem:[%s6678_s1 + $0x60] sm:$0xff] (!%p213_p2)   ;;  %v5487_v8 = vld [vmem:[%s6678_s1 + $0x68] sm:$0xff] (!%p213_p2)   ;;  %vm1748_vm1 = vsmask.f32 (!%p213_p2), 7938 }
   0x7   : > { %4865 = vmatpush3.bf16.msra.mxu0 (!%p213_p2), %v5482_v0  ;;  %v5488_v9 = vld [vmem:[%s6678_s1 + $0x70] sm:$0xff] (!%p213_p2)   ;;  %v5489_v10 = vld [vmem:[%s6678_s1 + $0x78] sm:$0xff] (!%p213_p2)   ;;  %v5490_v11 = vld [vmem:[%s6678_s1] sm:$0xff] (!%p213_p2)   ;;  %vm1754_vm3 = vsmask.f32 (!%p213_p2), 256  ;;  %vm2255_vm9 = vcmask (!%p213_p2), 1042432  }
   0x8   : > { %4866 = vmatprep.subr.bf16.mxu0 (!%p213_p2), %v5483_v1  ;;  %v5491_v18 = vld [vmem:[%s6678_s1 + $0x8] sm:$0xff] (!%p213_p2)   ;;  %v5492_v19 = vld [vmem:[%s6678_s1 + $0x10] sm:$0xff] (!%p213_p2)   ;;  %v5493_v26 = vld [vmem:[%s6678_s1 + $0x18] sm:$0xff] (!%p213_p2)   ;;  %vm1833_vm6 = vsmask.f32 (!%p213_p2), 3328  ;;  %vm2256_vm10 = vcmask (!%p213_p2), 1046532  }
   0x9   : > { %v5494_v27 = vld [vmem:[%s6678_s1 + $0x20] sm:$0xff] (!%p213_p2)   ;;  %v5495_v28 = vld [vmem:[%s6678_s1 + $0x28] sm:$0xff] (!%p213_p2)   ;;  %v5496_v29 = vld [vmem:[%s6678_s1 + $0x30] sm:$0xff] (!%p213_p2)   ;;  %vm1834_vm7 = vsmask.f32 (!%p213_p2), 7440 }
   0xa   : > { %v5497_v30 = vld [vmem:[%s6678_s1 + $0x38] sm:$0xff] (!%p213_p2)   ;;  %v5498_v31 = vld [vmem:[%s6678_s1 + $0x80] sm:$0xff] (!%p213_p2)   ;;  %v5499_v38 = vld [vmem:[%s6678_s1 + $0x88] sm:$0xff] (!%p213_p2)  }
   0xb   : > { %4867 = vmatpush3.bf16.msra.mxu0 (!%p213_p2), %v5483_v1  ;;  %v5500_v41 = vld [vmem:[%s6678_s1 + $0x90] sm:$0xff] (!%p213_p2)   ;;  %v5501_v45 = vld [vmem:[%s6678_s1 + $0x98] sm:$0xff] (!%p213_p2)   ;;  %v5502_v47 = vld [vmem:[%s6678_s1 + $0xa0] sm:$0xff] (!%p213_p2)  }
   0xc   : > { %4868 = vmatprep.subr.bf16.mxu0 (!%p213_p2), %v5484_v2  ;;  %v5503_v48 = vld [vmem:[%s6678_s1 + $0xa8] sm:$0xff] (!%p213_p2)   ;;  %v5504_v49 = vld [vmem:[%s6678_s1 + $0xb0] sm:$0xff] (!%p213_p2)   ;;  %v5505_v50 = vld [vmem:[%s6678_s1 + $0xb8] sm:$0xff] (!%p213_p2)  }
   0xd   : > { %s6693_s22 = smov (!%p242_p3, %s4036_s22), 1  ;;  %v5506_v53 = vld [vmem:[%s6678_s1 + $0xc0] sm:$0xff]   ;;  %v5507_v57 = vld [vmem:[%s6678_s1 + $0xc8] sm:$0xff]   ;;  %v5508_v61 = vld [vmem:[%s6678_s1 + $0xd0] sm:$0xff]  }
   0xe   : > { %s5472_s29 = smul.u32 576, %s6693_s22  ;;  %v5509_v1 = vld [vmem:[%s6678_s1 + $0xd8] sm:$0xff]   ;;  %vm6097_vm4 = vmand %vm1747_vm0, %vm1748_vm1 }
   0xf   : > { %4869 = vmatpush3.bf16.msra.mxu0 %v5484_v2  ;;  %vm6104_vm5 = vmand %vm1753_vm2, %vm1754_vm3 }
  0x10   : > { %s5719_s8 = scalar_lea.vmem %s6677_s0, %s5472_s29  ;;  %4870 = vmatprep.subr.bf16.mxu0 %v5485_v3  ;;  %vm6158_vm8 = vmor %vm1833_vm6, %vm1834_vm7 }
  0x11   : > { %v4044_v4 = vld [vmem:[%s5719_s8 + $0x90] sm:$0xff]  ;;  %v4045_v5 = vld [vmem:[%s5719_s8 + $0xa0] sm:$0xff]  ;;  %vm6222_vm11 = vmor %vm2255_vm9, %vm2256_vm10 }
  0x12   : > { %v290_v6 = vpack.c.bf16 %v4045_v5, %v4044_v4  ;;  %v4046_v12 = vld [vmem:[%s5719_s8 + $0xb0] sm:$0xff]  ;;  %v4047_v13 = vld [vmem:[%s5719_s8 + $0xc0] sm:$0xff]  ;;  %v5511_v4 = vld [vmem:[%s6678_s1 + $0xe8] sm:$0xff]  }
  0x13   : > { %4871 = vmatpush3.bf16.msra.mxu0 %v5485_v3  ;;  %v4048_v14 = vld [vmem:[%s5719_s8 + $0xd0] sm:$0xff]  ;;  %v4049_v15 = vld [vmem:[%s5719_s8 + $0xe0] sm:$0xff]  ;;  %v291_v16 = vpack.c.bf16 %v4047_v13, %v4046_v12  ;;  %v5515_v13 = vld [vmem:[%s6678_s1 + $0x108] sm:$0xff]  }
  0x14   : > { %4880 = vmatprep.mubr.bf16.mxu0 %v290_v6  ;;  %4872 = vmatprep.subr.bf16.mxu0 %v5486_v7  ;;  %v292_v17 = vpack.c.bf16 %v4049_v15, %v4048_v14  ;;  %v5752_v20 = vld [vmem:[%s5719_s8 + $0xf0] sm:$0xff]  ;;  %v4051_v21 = vld [vmem:[%s5719_s8 + $0x100] sm:$0xff]  ;;  %v5513_v6 = vld [vmem:[%s6678_s1 + $0xf8] sm:$0xff]  }
  0x15   : > { %v253_v22 = vld [vmem:[%s5719_s8] sm:$0xff]  ;;  %v5757_v23 = vld [vmem:[%s5719_s8 + $0x10] sm:$0xff]  ;;  %v293_v24 = vpack.c.bf16 %v4051_v21, %v5752_v20 }
  0x16   : > { %v261_v25 = vpack.c.bf16 %v5757_v23, %v253_v22  ;;  %v5780_v32 = vld [vmem:[%s5719_s8 + $0x20] sm:$0xff]  ;;  %v5783_v33 = vld [vmem:[%s5719_s8 + $0x30] sm:$0xff]  ;;  %v5517_v22 = vld [vmem:[%s6678_s1 + $0x118] sm:$0xff]  }
  0x17   : > { %4873 = vmatpush3.bf16.msra.mxu0 %v5486_v7  ;;  %v5786_v34 = vld [vmem:[%s5719_s8 + $0x40] sm:$0xff]  ;;  %v5789_v35 = vld [vmem:[%s5719_s8 + $0x50] sm:$0xff]  ;;  %v262_v36 = vpack.c.bf16 %v5783_v33, %v5780_v32 }
  0x18   : > { %4874 = vmatprep.subr.bf16.mxu0 %v5487_v8  ;;  %v263_v37 = vpack.c.bf16 %v5789_v35, %v5786_v34  ;;  %v5799_v39 = vld [vmem:[%s5719_s8 + $0x60] sm:$0xff]  ;;  %v5802_v40 = vld [vmem:[%s5719_s8 + $0x70] sm:$0xff] }
  0x19   : > { %v537_v42 = vld [vmem:[%s5719_s8 + $0x1] sm:$0xff]  ;;  %v5809_v43 = vld [vmem:[%s5719_s8 + $0x11] sm:$0xff]  ;;  %v264_v44 = vpack.c.bf16 %v5802_v40, %v5799_v39 }
  0x1a   : > { %v545_v46 = vpack.c.bf16 %v5809_v43, %v537_v42  ;;  %v5830_v51 = vld [vmem:[%s5719_s8 + $0x21] sm:$0xff]  ;;  %v5833_v52 = vld [vmem:[%s5719_s8 + $0x31] sm:$0xff] }
  0x1b   : > { %4875 = vmatpush3.bf16.msra.mxu0 %v5487_v8  ;;  %v5839_v54 = vld [vmem:[%s5719_s8 + $0x41] sm:$0xff]  ;;  %v5842_v55 = vld [vmem:[%s5719_s8 + $0x51] sm:$0xff]  ;;  %v546_v56 = vpack.c.bf16 %v5833_v52, %v5830_v51 }
  0x1c   : > { %4876 = vmatprep.subr.bf16.mxu0 %v5488_v9  ;;  %v547_v58 = vpack.c.bf16 %v5842_v55, %v5839_v54  ;;  %v5852_v59 = vld [vmem:[%s5719_s8 + $0x61] sm:$0xff]  ;;  %v5855_v60 = vld [vmem:[%s5719_s8 + $0x71] sm:$0xff] }
  0x1d   : > { %v4108_v62 = vld [vmem:[%s5719_s8 + $0x120] sm:$0xff]  ;;  %v4109_v63 = vld [vmem:[%s5719_s8 + $0x130] sm:$0xff]  ;;  %v548_v0 = vpack.c.bf16 %v5855_v60, %v5852_v59  ;;  %v5523_v42 = vld [vmem:[%s6678_s1 + $0x148] sm:$0xff]  }
  0x1e   : > { %v696_v2 = vpack.c.bf16 %v4109_v63, %v4108_v62  ;;  %v5510_v3 = vld [vmem:[%s6678_s1 + $0xe0] sm:$0xff]   ;;  %v5512_v5 = vld [vmem:[%s6678_s1 + $0xf0] sm:$0xff]  }
  0x1f   : > { %4877 = vmatpush3.bf16.msra.mxu0 %v5488_v9  ;;  %v4110_v7 = vld [vmem:[%s5719_s8 + $0x140] sm:$0xff]  ;;  %v4111_v8 = vld [vmem:[%s5719_s8 + $0x150] sm:$0xff] }
  0x20   : > { %4878 = vmatprep.subr.bf16.mxu0 %v5489_v10  ;;  %v5514_v9 = vld [vmem:[%s6678_s1 + $0x100] sm:$0xff]   ;;  %v697_v12 = vpack.c.bf16 %v4111_v8, %v4110_v7  ;;  %v4175_v63 = vld [vmem:[%s5719_s8 + $0x151] sm:$0xff] }
  0x21   : > { %v4114_v15 = vld [vmem:[%s5719_s8 + $0x180] sm:$0xff]  ;;  %v4179_v7 = vld [vmem:[%s5719_s8 + $0x191] sm:$0xff] }
  0x22   : > { %v4174_v62 = vld [vmem:[%s5719_s8 + $0x141] sm:$0xff]  ;;  %v5532_v8 = vld [vmem:[%s6678_s1 + $0x190] sm:$0xff]  }
  0x23   : > { %4879 = vmatpush3.bf16.msra.mxu0 %v5489_v10  ;;  %v4112_v10 = vld [vmem:[%s5719_s8 + $0x160] sm:$0xff] }
  0x24   : > { %4888 = vmatprep.subr.bf16.mxu0 %v5490_v11 }
  0x26   : > { %4881 = vmatmul.mubr.bf16.vlgmr.msra.gmra.mrb[0].mxu0 %v291_v16  ;;  %v4115_v16 = vld [vmem:[%s5719_s8 + $0x190] sm:$0xff] }
  0x27   : > { %4889 = vmatpush3.bf16.msra.mxu0 %v5490_v11  ;;  %4884 = vmatprep.mubr.bf16.mxu0 %v292_v17  ;;  %v4113_v11 = vld [vmem:[%s5719_s8 + $0x170] sm:$0xff]  ;;  %v699_v21 = vpack.c.bf16 %v4115_v16, %v4114_v15  ;;  %v1149_v15 = vpack.c.bf16 %v5786_v34, %v5783_v33  ;;  %v1150_v16 = vpack.c.bf16 %v5799_v39, %v5789_v35  ;;  %v5646_v34 = vld [vmem:[%s5719_s8 + $0xa0] sm:$0xff]  ;;  %v5541_v39 = vld [vmem:[%s6678_s1 + $0x1d8] sm:$0xff]  }
  0x28   : > { %4890 = vmatprep.subr.bf16.mxu0 %v5491_v18  ;;  %v698_v14 = vpack.c.bf16 %v4113_v11, %v4112_v10  ;;  %v5516_v17 = vld [vmem:[%s6678_s1 + $0x110] sm:$0xff]   ;;  %v1148_v10 = vpack.c.bf16 %v5780_v32, %v5757_v23  ;;  %v5533_v11 = vld [vmem:[%s6678_s1 + $0x198] sm:$0xff]  }
  0x29   : > { %v5536_v23 = vld [vmem:[%s6678_s1 + $0x1b0] sm:$0xff]   ;;  %v5537_v32 = vld [vmem:[%s6678_s1 + $0x1b8] sm:$0xff]  }
  0x2b   : > { %4891 = vmatpush3.bf16.msra.mxu0 %v5491_v18  ;;  %v4140_v18 = vld [vmem:[%s5719_s8 + $0x1b0] sm:$0xff] }
  0x2c   : > { %4892 = vmatprep.subr.bf16.mxu0 %v5492_v19 }
  0x2e   : > { %4885 = vmatmul.mubr.bf16.gmra.mrb[4].mxu0 %v293_v24 }
  0x2f   : > { %4893 = vmatpush3.bf16.msra.mxu0 %v5492_v19  ;;  %4904 = vmatprep.mubr.bf16.mxu0 %v261_v25  ;;  %v4141_v19 = vld [vmem:[%s5719_s8 + $0x1c0] sm:$0xff] }
  0x30   : > { %4894 = vmatprep.subr.bf16.mxu0 %v5493_v26  ;;  %v847_v24 = vpack.c.bf16 %v4141_v19, %v4140_v18  ;;  %v5518_v25 = vld [vmem:[%s6678_s1 + $0x120] sm:$0xff]   ;;  %v5540_v19 = vld [vmem:[%s6678_s1 + $0x1d0] sm:$0xff]  }
  0x31   : > { %v4211_v18 = vld [vmem:[%s5719_s8 + $0x80] sm:$0xff] }
  0x32   : > { %v1151_v33 = vpack.c.bf16 %v4211_v18, %v5802_v40  ;;  %v5543_v40 = vld [vmem:[%s6678_s1 + $0x1e8] sm:$0xff]  }
  0x33   : > { %4895 = vmatpush3.bf16.msra.mxu0 %v5493_v26  ;;  %v5519_v26 = vld [vmem:[%s6678_s1 + $0x128] sm:$0xff]  }
  0x34   : > { %4896 = vmatprep.subr.bf16.mxu0 %v5494_v27 }
  0x37   : > { %4897 = vmatpush3.bf16.msra.mxu0 %v5494_v27  ;;  %v5520_v27 = vld [vmem:[%s6678_s1 + $0x130] sm:$0xff]  }
  0x38   : > { %4898 = vmatprep.subr.bf16.mxu0 %v5495_v28 }
  0x3b   : > { %4899 = vmatpush3.bf16.msra.mxu0 %v5495_v28  ;;  %v5521_v28 = vld [vmem:[%s6678_s1 + $0x138] sm:$0xff]  }
  0x3c   : > { %4900 = vmatprep.subr.bf16.mxu0 %v5496_v29 }
  0x3f   : > { %4901 = vmatpush3.bf16.msra.mxu0 %v5496_v29  ;;  %v4142_v29 = vld [vmem:[%s5719_s8 + $0x1d0] sm:$0xff] }
  0x40   : > { %4902 = vmatprep.subr.bf16.mxu0 %v5497_v30 }
  0x43   : > { %4903 = vmatpush3.bf16.msra.mxu0 %v5497_v30  ;;  %v4143_v30 = vld [vmem:[%s5719_s8 + $0x1e0] sm:$0xff] }
  0x44   : > { %4912 = vmatprep.subr.bf16.mxu0 %v5498_v31 }
  0x46   : > { %4905 = vmatmul.mubr.bf16.vlgmr.msra.gmra.mrb[0].mxu0 %v262_v36  ;;  %v4144_v36 = vld [vmem:[%s5719_s8 + $0x1f0] sm:$0xff] }
  0x47   : > { %4913 = vmatpush3.bf16.msra.mxu0 %v5498_v31  ;;  %4908 = vmatprep.mubr.bf16.mxu0 %v263_v37  ;;  %v5522_v31 = vld [vmem:[%s6678_s1 + $0x140] sm:$0xff]  }
  0x48   : > { %4914 = vmatprep.subr.bf16.mxu0 %v5499_v38  ;;  %v4145_v37 = vld [vmem:[%s5719_s8 + $0x200] sm:$0xff] }
  0x4b   : > { %4915 = vmatpush3.bf16.msra.mxu0 %v5499_v38  ;;  %v848_v38 = vpack.c.bf16 %v4143_v30, %v4142_v29  ;;  %v5650_v30 = vld [vmem:[%s5719_s8 + $0xe0] sm:$0xff] }
  0x4c   : > { %4916 = vmatprep.subr.bf16.mxu0 %v5500_v41 }
  0x4e   : > { %4909 = vmatmul.mubr.bf16.gmra.mrb[4].mxu0 %v264_v44  ;;  %v4146_v44 = vld [vmem:[%s5719_s8 + $0x210] sm:$0xff] }
  0x4f   : > { %4917 = vmatpush3.bf16.msra.mxu0 %v5500_v41  ;;  %4928 = vmatprep.mubr.bf16.mxu0 %v545_v46  ;;  %v849_v41 = vpack.c.bf16 %v4145_v37, %v4144_v36  ;;  %v5524_v46 = vld [vmem:[%s6678_s1 + $0x150] sm:$0xff]   ;;  %v5547_v36 = vld [vmem:[%s6678_s1 + $0x208] sm:$0xff]  }
  0x50   : > { %4918 = vmatprep.subr.bf16.mxu0 %v5501_v45  ;;  %v4243_v37 = vld [vmem:[%s5719_s8 + $0x110] sm:$0xff] }
  0x53   : > { %4919 = vmatpush3.bf16.msra.mxu0 %v5501_v45  ;;  %v4147_v45 = vld [vmem:[%s5719_s8 + $0x220] sm:$0xff] }
  0x54   : > { %4920 = vmatprep.subr.bf16.mxu0 %v5502_v47 }
  0x57   : > { %4921 = vmatpush3.bf16.msra.mxu0 %v5502_v47  ;;  %v4172_v47 = vld [vmem:[%s5719_s8 + $0x121] sm:$0xff] }
  0x58   : > { %4922 = vmatprep.subr.bf16.mxu0 %v5503_v48 }
  0x5b   : > { %4923 = vmatpush3.bf16.msra.mxu0 %v5503_v48  ;;  %v4173_v48 = vld [vmem:[%s5719_s8 + $0x131] sm:$0xff] }
  0x5c   : > { %4924 = vmatprep.subr.bf16.mxu0 %v5504_v49 }
  0x5f   : > { %4925 = vmatpush3.bf16.msra.mxu0 %v5504_v49  ;;  %v850_v49 = vpack.c.bf16 %v4147_v45, %v4146_v44  ;;  %v5549_v44 = vld [vmem:[%s6678_s1 + $0x218] sm:$0xff]   ;;  %v5550_v45 = vld [vmem:[%s6678_s1 + $0x220] sm:$0xff]  }
  0x60   : > { %4926 = vmatprep.subr.bf16.mxu0 %v5505_v50 }
  0x63   : > { %4927 = vmatpush3.bf16.msra.mxu0 %v5505_v50  ;;  %v997_v50 = vpack.c.bf16 %v4173_v48, %v4172_v47  ;;  %v1450_v47 = vpack.c.bf16 %v5839_v54, %v5833_v52  ;;  %v1451_v48 = vpack.c.bf16 %v5852_v59, %v5842_v55  ;;  %v5555_v52 = vld [vmem:[%s6680_s3 + $0x48] sm:$0xff]   ;;  %v5556_v54 = vld [vmem:[%s6680_s3 + $0x50] sm:$0xff]   ;;  %v5557_v55 = vld [vmem:[%s6680_s3 + $0x58] sm:$0xff]  }
  0x64   : > { %4936 = vmatprep.subr.bf16.mxu0 %v5506_v53  ;;  %v5558_v59 = vld [vmem:[%s6680_s3 + $0x60] sm:$0xff]  }
  0x66   : > { %4929 = vmatmul.mubr.bf16.vlgmr.msra.gmra.mrb[0].mxu0 %v546_v56  ;;  %v5526_v56 = vld [vmem:[%s6678_s1 + $0x160] sm:$0xff]  }
  0x67   : > { %4937 = vmatpush3.bf16.msra.mxu0 %v5506_v53  ;;  %4932 = vmatprep.mubr.bf16.mxu0 %v547_v58  ;;  %v5525_v53 = vld [vmem:[%s6678_s1 + $0x158] sm:$0xff]   ;;  %v5528_v58 = vld [vmem:[%s6678_s1 + $0x170] sm:$0xff]  }
  0x68   : > { %4938 = vmatprep.subr.bf16.mxu0 %v5507_v57 }
  0x6b   : > { %4939 = vmatpush3.bf16.msra.mxu0 %v5507_v57  ;;  %v5527_v57 = vld [vmem:[%s6678_s1 + $0x168] sm:$0xff]  }
  0x6c   : > { %4940 = vmatprep.subr.bf16.mxu0 %v5508_v61 }
  0x6e   : > { %4933 = vmatmul.mubr.bf16.gmra.mrb[4].mxu0 %v548_v0  ;;  %v5530_v0 = vld [vmem:[%s6678_s1 + $0x180] sm:$0xff]  }
  0x6f   : > { %4941 = vmatpush3.bf16.msra.mxu0 %v5508_v61  ;;  %4952 = vmatprep.mubr.bf16.mxu0 %v696_v2  ;;  %v5529_v61 = vld [vmem:[%s6678_s1 + $0x178] sm:$0xff]  }
  0x70   : > { %4942 = vmatprep.subr.bf16.mxu0 %v5509_v1  ;;  %v4177_v2 = vld [vmem:[%s5719_s8 + $0x171] sm:$0xff] }
  0x73   : > { %4943 = vmatpush3.bf16.msra.mxu0 %v5509_v1  ;;  %v4176_v1 = vld [vmem:[%s5719_s8 + $0x161] sm:$0xff] }
  0x74   : > { %4944 = vmatprep.subr.bf16.mxu0 %v5510_v3 }
  0x77   : > { %4945 = vmatpush3.bf16.msra.mxu0 %v5510_v3  ;;  %v998_v3 = vpack.c.bf16 %v4175_v63, %v4174_v62  ;;  %v6078_v62 = vld [vmem:[%s6679_s2] ss:$0 sm:$0xff] }
  0x78   : > { %4946 = vmatprep.subr.bf16.mxu0 %v5511_v4 }
  0x7b   : > { %4947 = vmatpush3.bf16.msra.mxu0 %v5511_v4  ;;  %v999_v4 = vpack.c.bf16 %v4177_v2, %v4176_v1 }
  0x7c   : > { %4948 = vmatprep.subr.bf16.mxu0 %v5512_v5 }
  0x7f   : > { %4949 = vmatpush3.bf16.msra.mxu0 %v5512_v5  ;;  %v5531_v5 = vld [vmem:[%s6678_s1 + $0x188] sm:$0xff]  }
  0x80   : > { %4950 = vmatprep.subr.bf16.mxu0 %v5513_v6 }
  0x83   : > { %4951 = vmatpush3.bf16.msra.mxu0 %v5513_v6  ;;  %v4178_v6 = vld [vmem:[%s5719_s8 + $0x181] sm:$0xff] }
  0x84   : > { %4960 = vmatprep.subr.bf16.mxu0 %v5514_v9 }
  0x86   : > { %4953 = vmatmul.mubr.bf16.vlgmr.msra.gmra.mrb[0].mxu0 %v697_v12  ;;  %v5534_v12 = vld [vmem:[%s6678_s1 + $0x1a0] sm:$0xff]  }
  0x87   : > { %4961 = vmatpush3.bf16.msra.mxu0 %v5514_v9  ;;  %4956 = vmatprep.mubr.bf16.mxu0 %v698_v14  ;;  %v1000_v9 = vpack.c.bf16 %v4179_v7, %v4178_v6  ;;  %v5538_v14 = vld [vmem:[%s6678_s1 + $0x1c0] sm:$0xff]  }
  0x88   : > { %4962 = vmatprep.subr.bf16.mxu0 %v5515_v13 }
  0x8b   : > { %4963 = vmatpush3.bf16.msra.mxu0 %v5515_v13  ;;  %v5535_v13 = vld [vmem:[%s6678_s1 + $0x1a8] sm:$0xff]  }
  0x8c   : > { %4964 = vmatprep.subr.bf16.mxu0 %v5516_v17 }
  0x8e   : > { %4957 = vmatmul.mubr.bf16.gmra.mrb[4].mxu0 %v699_v21  ;;  %v5647_v21 = vld [vmem:[%s5719_s8 + $0xb0] sm:$0xff] }
  0x8f   : > { %4965 = vmatpush3.bf16.msra.mxu0 %v5516_v17  ;;  %4976 = vmatprep.mubr.bf16.mxu0 %v847_v24  ;;  %v5539_v17 = vld [vmem:[%s6678_s1 + $0x1c8] sm:$0xff]   ;;  %v1299_v35 = vpack.c.bf16 %v5647_v21, %v5646_v34  ;;  %v5544_v24 = vld [vmem:[%s6678_s1 + $0x1f0] sm:$0xff]  }
  0x90   : > { %4966 = vmatprep.subr.bf16.mxu0 %v5517_v22 }
  0x93   : > { %4967 = vmatpush3.bf16.msra.mxu0 %v5517_v22  ;;  %v5542_v22 = vld [vmem:[%s6678_s1 + $0x1e0] sm:$0xff]  }
  0x94   : > { %4968 = vmatprep.subr.bf16.mxu0 %v5518_v25 }
  0x97   : > { %4969 = vmatpush3.bf16.msra.mxu0 %v5518_v25  ;;  %v5545_v25 = vld [vmem:[%s6678_s1 + $0x1f8] sm:$0xff]  }
  0x98   : > { %4970 = vmatprep.subr.bf16.mxu0 %v5519_v26 }
  0x9b   : > { %4971 = vmatpush3.bf16.msra.mxu0 %v5519_v26  ;;  %v5546_v26 = vld [vmem:[%s6678_s1 + $0x200] sm:$0xff]  }
  0x9c   : > { %4972 = vmatprep.subr.bf16.mxu0 %v5520_v27 }
  0x9f   : > { %4973 = vmatpush3.bf16.msra.mxu0 %v5520_v27  ;;  %v5648_v27 = vld [vmem:[%s5719_s8 + $0xc0] sm:$0xff] }
  0xa0   : > { %4974 = vmatprep.subr.bf16.mxu0 %v5521_v28 }
  0xa3   : > { %4975 = vmatpush3.bf16.msra.mxu0 %v5521_v28  ;;  %v5649_v28 = vld [vmem:[%s5719_s8 + $0xd0] sm:$0xff] }
  0xa4   : > { %4984 = vmatprep.subr.bf16.mxu0 %v5522_v31  ;;  %v1300_v29 = vpack.c.bf16 %v5649_v28, %v5648_v27 }
  0xa6   : > { %4977 = vmatmul.mubr.bf16.vlgmr.msra.gmra.mrb[0].mxu0 %v848_v38  ;;  %v5548_v38 = vld [vmem:[%s6678_s1 + $0x210] sm:$0xff]  }
  0xa7   : > { %4985 = vmatpush3.bf16.msra.mxu0 %v5522_v31  ;;  %4980 = vmatprep.mubr.bf16.mxu0 %v849_v41  ;;  %v1301_v31 = vpack.c.bf16 %v5752_v20, %v5650_v30  ;;  %v5651_v41 = vld [vmem:[%s5719_s8 + $0x100] sm:$0xff]  ;;  %v1449_v20 = vpack.c.bf16 %v5830_v51, %v5809_v43  ;;  %v5551_v43 = vld [vmem:[%s6678_s1 + $0x228] sm:$0xff]   ;;  %v5552_v51 = vld [vmem:[%s6678_s1 + $0x230] sm:$0xff]  }
  0xa8   : > { %4986 = vmatprep.subr.bf16.mxu0 %v5523_v42 }
  0xab   : > { %4987 = vmatpush3.bf16.msra.mxu0 %v5523_v42  ;;  %v1302_v42 = vpack.c.bf16 %v4243_v37, %v5651_v41 }
  0xac   : > { %4988 = vmatprep.subr.bf16.mxu0 %v5524_v46 }
  0xae   : > { %4981 = vmatmul.mubr.bf16.gmra.mrb[4].mxu0 %v850_v49  ;;  %v4275_v49 = vld [vmem:[%s5719_s8 + $0x81] sm:$0xff] }
  0xaf   : > { %4989 = vmatpush3.bf16.msra.mxu0 %v5524_v46  ;;  %5000 = vmatprep.mubr.bf16.mxu0 %v997_v50  ;;  %v5553_v46 = vld [vmem:[%s6678_s1 + $0x238] sm:$0xff]   ;;  %v1452_v50 = vpack.c.bf16 %v4275_v49, %v5855_v60  ;;  %v5559_v60 = vld [vmem:[%s6680_s3 + $0x68] sm:$0xff]  }
  0xb0   : > { %4990 = vmatprep.subr.bf16.mxu0 %v5525_v53 }
  0xb3   : > { %4991 = vmatpush3.bf16.msra.mxu0 %v5525_v53  ;;  %v5554_v53 = vld [vmem:[%s6680_s3 + $0x40] sm:$0xff]  }
  0xb4   : > { %4992 = vmatprep.subr.bf16.mxu0 %v5526_v56  ;;  %5080 = vmatprep.subr.bf16.mxu1 %v5554_v53 }
  0xb5   : > { %5081 = vmatpush3.bf16.msra.mxu1 %v5554_v53 }
  0xb6   : > { %5082 = vmatprep.subr.bf16.mxu1 %v5555_v52 }
  0xb7   : > { %4993 = vmatpush3.bf16.msra.mxu0 %v5526_v56  ;;  %v5660_v56 = vmov 0  }
  0xb8   : > { %4994 = vmatprep.subr.bf16.mxu0 %v5527_v57  ;;  %1620 = vst [vmem:[#allocation2 + $0x18] sm:$0xf] %v5660_v56  ;;  %1621 = vst [vmem:[#allocation2 + $0x1c] sm:$0x1] %v5660_v56 }
  0xb9   : > { %1614 = vst [vmem:[#allocation2] sm:$0xf] %v5660_v56  ;;  %1615 = vst [vmem:[#allocation2 + $0x4] sm:$0x1] %v5660_v56  ;;  %5083 = vmatpush3.bf16.msra.mxu1 %v5555_v52 }
  0xba   : > { %1616 = vst [vmem:[#allocation2 + $0x8] sm:$0xf] %v5660_v56  ;;  %1617 = vst [vmem:[#allocation2 + $0xc] sm:$0x1] %v5660_v56  ;;  %5084 = vmatprep.subr.bf16.mxu1 %v5556_v54 }
  0xbb   : > { %4995 = vmatpush3.bf16.msra.mxu0 %v5527_v57  ;;  %1618 = vst [vmem:[#allocation2 + $0x10] sm:$0xf] %v5660_v56  ;;  %1619 = vst [vmem:[#allocation2 + $0x14] sm:$0x1] %v5660_v56  ;;  %v5560_v57 = vld [vmem:[%s6680_s3 + $0x70] sm:$0xff]  }
  0xbc   : > { %4996 = vmatprep.subr.bf16.mxu0 %v5528_v58  ;;  %1622 = vst [vmem:[#allocation2 + $0x20] sm:$0xf] %v5660_v56  ;;  %1623 = vst [vmem:[#allocation2 + $0x24] sm:$0x1] %v5660_v56 }
  0xbd   : > { %1624 = vst [vmem:[#allocation2 + $0x28] sm:$0xf] %v5660_v56  ;;  %1625 = vst [vmem:[#allocation2 + $0x2c] sm:$0x1] %v5660_v56  ;;  %5085 = vmatpush3.bf16.msra.mxu1 %v5556_v54 }
  0xbe   : > { %1626 = vst [vmem:[#allocation2 + $0x30] sm:$0xf] %v5660_v56  ;;  %1627 = vst [vmem:[#allocation2 + $0x34] sm:$0x1] %v5660_v56  ;;  %5086 = vmatprep.subr.bf16.mxu1 %v5557_v55 }
  0xbf   : > { %4997 = vmatpush3.bf16.msra.mxu0 %v5528_v58  ;;  %1628 = vst [vmem:[#allocation2 + $0x38] sm:$0xf] %v5660_v56  ;;  %1629 = vst [vmem:[#allocation2 + $0x3c] sm:$0x1] %v5660_v56  ;;  %v5561_v58 = vld [vmem:[%s6680_s3 + $0x78] sm:$0xff]  }
  0xc0   : > { %4998 = vmatprep.subr.bf16.mxu0 %v5529_v61  ;;  %1630 = vst [vmem:[#allocation2 + $0x40] sm:$0xf] %v5660_v56  ;;  %1631 = vst [vmem:[#allocation2 + $0x44] sm:$0x1] %v5660_v56  ;;  %v6080_v63 = vld [vmem:[#allocation2] sm:$0xf] }
  0xc1   : > { %1632 = vst [vmem:[#allocation2 + $0x48] sm:$0xf] %v5660_v56  ;;  %1633 = vst [vmem:[#allocation2 + $0x4c] sm:$0x1] %v5660_v56  ;;  %5087 = vmatpush3.bf16.msra.mxu1 %v5557_v55  ;;  %v1765_v34 = vld [vmem:[#allocation2 + $0x18] sm:$0xf] }
  0xc2   : > { %5088 = vmatprep.subr.bf16.mxu1 %v5558_v59  ;;  %v1768_v21 = vld [vmem:[#allocation2 + $0x1c] sm:$0x1]  ;;  %v1756_v37 = vld [vmem:[#allocation2 + $0xc] sm:$0x1] }
  0xc3   : > { %4999 = vmatpush3.bf16.msra.mxu0 %v5529_v61  ;;  %v6072_v61 = vld [vmem:[%s6680_s3] sm:$0xff]  }
  0xc4   : > { %5008 = vmatprep.subr.bf16.mxu0 %v5530_v0 }
  0xc5   : > { %5089 = vmatpush3.bf16.msra.mxu1 %v5558_v59 }
  0xc6   : > { %5001 = vmatmul.mubr.bf16.vlgmr.msra.gmra.mrb[0].mxu0 %v998_v3  ;;  %5090 = vmatprep.subr.bf16.mxu1 %v5559_v60 }
  0xc7   : > { %5009 = vmatpush3.bf16.msra.mxu0 %v5530_v0  ;;  %5004 = vmatprep.mubr.bf16.mxu0 %v999_v4 }
  0xc8   : > { %5010 = vmatprep.subr.bf16.mxu0 %v5531_v5 }
  0xc9   : > { %5091 = vmatpush3.bf16.msra.mxu1 %v5559_v60  ;;  %v1759_v60 = vld [vmem:[#allocation2 + $0x10] sm:$0xf] }
  0xca   : > { %5092 = vmatprep.subr.bf16.mxu1 %v5560_v57 }
  0xcb   : > { %5011 = vmatpush3.bf16.msra.mxu0 %v5531_v5  ;;  %v1837_v5 = vshrl.u32 %v6080_v63, 16 }
  0xcc   : > { %5012 = vmatprep.subr.bf16.mxu0 %v5532_v8 }
  0xcd   : > { %5093 = vmatpush3.bf16.msra.mxu1 %v5560_v57  ;;  %v1762_v57 = vld [vmem:[#allocation2 + $0x14] sm:$0x1] }
  0xce   : > { %5005 = vmatmul.mubr.bf16.gmra.mrb[4].mxu0 %v1000_v9  ;;  %5094 = vmatprep.subr.bf16.mxu1 %v5561_v58  ;;  %v1840_v9 = vshll.u32 %v6080_v63, 16 }
  0xcf   : > { %5013 = vmatpush3.bf16.msra.mxu0 %v5532_v8  ;;  %5024 = vmatprep.mubr.bf16.mxu0 %v1148_v10 }
  0xd0   : > { %5014 = vmatprep.subr.bf16.mxu0 %v5533_v11  ;;  %v6092_v18 = vrot.slane %v1840_v9, 5 }
  0xd1   : > { %5095 = vmatpush3.bf16.msra.mxu1 %v5561_v58 }
  0xd2   : > { %5104 = vmatprep.subr.bf16.mxu1 %v6072_v61 }
  0xd3   : > { %5015 = vmatpush3.bf16.msra.mxu0 %v5533_v11 }
  0xd4   : > { %5016 = vmatprep.subr.bf16.mxu0 %v5534_v12 }
  0xd7   : > { %5017 = vmatpush3.bf16.msra.mxu0 %v5534_v12 }
  0xd8   : > { %5018 = vmatprep.subr.bf16.mxu0 %v5535_v13 }
  0xdb   : > { %5019 = vmatpush3.bf16.msra.mxu0 %v5535_v13 }
  0xdc   : > { %5020 = vmatprep.subr.bf16.mxu0 %v5536_v23 }
  0xdf   : > { %5021 = vmatpush3.bf16.msra.mxu0 %v5536_v23 }
  0xe0   : > { %5022 = vmatprep.subr.bf16.mxu0 %v5537_v32 }
  0xe3   : > { %5023 = vmatpush3.bf16.msra.mxu0 %v5537_v32 }
  0xe4   : > { %5032 = vmatprep.subr.bf16.mxu0 %v5538_v14 }
  0xe6   : > { %5025 = vmatmul.mubr.bf16.vlgmr.msra.gmra.mrb[0].mxu0 %v1149_v15  ;;  %v6090_v15 = vrot.slane %v1837_v5, 4 }
  0xe7   : > { %5033 = vmatpush3.bf16.msra.mxu0 %v5538_v14  ;;  %5028 = vmatprep.mubr.bf16.mxu0 %v1150_v16  ;;  %v6088_v14 = vld [vmem:[#allocation2 + $0x4] sm:$0x1] }
  0xe8   : > { %5034 = vmatprep.subr.bf16.mxu0 %v5539_v17 }
  0xeb   : > { %5035 = vmatpush3.bf16.msra.mxu0 %v5539_v17 }
  0xec   : > { %5036 = vmatprep.subr.bf16.mxu0 %v5540_v19 }
  0xee   : > { %5029 = vmatmul.mubr.bf16.gmra.mrb[4].mxu0 %v1151_v33 }
  0xef   : > { %5037 = vmatpush3.bf16.msra.mxu0 %v5540_v19  ;;  %5048 = vmatprep.mubr.bf16.mxu0 %v1299_v35  ;;  %v1846_v19 = vshll.u32 %v6088_v14, 16 }
  0xf0   : > { %5038 = vmatprep.subr.bf16.mxu0 %v5541_v39 }
  0xf3   : > { %5039 = vmatpush3.bf16.msra.mxu0 %v5541_v39 }
  0xf4   : > { %5040 = vmatprep.subr.bf16.mxu0 %v5542_v22 }
  0xf7   : > { %5041 = vmatpush3.bf16.msra.mxu0 %v5542_v22 }
  0xf8   : > { %5042 = vmatprep.subr.bf16.mxu0 %v5543_v40 }
  0xfb   : > { %5043 = vmatpush3.bf16.msra.mxu0 %v5543_v40 }
  0xfc   : > { %5044 = vmatprep.subr.bf16.mxu0 %v5544_v24 }
  0xff   : > { %5045 = vmatpush3.bf16.msra.mxu0 %v5544_v24 }
 0x100   : > { %5046 = vmatprep.subr.bf16.mxu0 %v5545_v25 }
 0x103   : > { %5047 = vmatpush3.bf16.msra.mxu0 %v5545_v25 }
 0x104   : > { %5056 = vmatprep.subr.bf16.mxu0 %v5546_v26 }
 0x106   : > { %5049 = vmatmul.mubr.bf16.vlgmr.msra.gmra.mrb[0].mxu0 %v1300_v29 }
 0x107   : > { %5057 = vmatpush3.bf16.msra.mxu0 %v5546_v26  ;;  %5052 = vmatprep.mubr.bf16.mxu0 %v1301_v31  ;;  %v1750_v26 = vld [vmem:[#allocation2 + $0x8] sm:$0xf] }
 0x108   : > { %5058 = vmatprep.subr.bf16.mxu0 %v5547_v36 }
 0x10b   : > { %5059 = vmatpush3.bf16.msra.mxu0 %v5547_v36 }
 0x10c   : > { %5060 = vmatprep.subr.bf16.mxu0 %v5548_v38 }
 0x10e   : > { %5053 = vmatmul.mubr.bf16.gmra.mrb[4].mxu0 %v1302_v42 }
 0x10f   : > { %5061 = vmatpush3.bf16.msra.mxu0 %v5548_v38  ;;  %5072 = vmatprep.mubr.bf16.mxu0 %v1449_v20 }
 0x110   : > { %5062 = vmatprep.subr.bf16.mxu0 %v5549_v44 }
 0x113   : > { %5063 = vmatpush3.bf16.msra.mxu0 %v5549_v44 }
 0x114   : > { %5064 = vmatprep.subr.bf16.mxu0 %v5550_v45 }
 0x117   : > { %5065 = vmatpush3.bf16.msra.mxu0 %v5550_v45 }
 0x118   : > { %5066 = vmatprep.subr.bf16.mxu0 %v5551_v43 }
 0x11b   : > { %5067 = vmatpush3.bf16.msra.mxu0 %v5551_v43 }
 0x11c   : > { %5068 = vmatprep.subr.bf16.mxu0 %v5552_v51 }
 0x11f   : > { %5069 = vmatpush3.bf16.msra.mxu0 %v5552_v51  ;;  %v1771_v51 = vld [vmem:[#allocation2 + $0x20] sm:$0xf] }
 0x120   : > { %5070 = vmatprep.subr.bf16.mxu0 %v5553_v46 }
 0x123   : > { %5071 = vmatpush3.bf16.msra.mxu0 %v5553_v46 }
 0x126   : > { %5073 = vmatmul.mubr.bf16.vlgmr.msra.gmra.mrb[0].mxu0 %v1450_v47 }
 0x127   : > { %5076 = vmatprep.mubr.bf16.mxu0 %v1451_v48 }
 0x12e   : > { %5077 = vmatmul.mubr.bf16.gmra.mrb[4].mxu0 %v1452_v50  ;;  %v1774_v50 = vld [vmem:[#allocation2 + $0x24] sm:$0x1] }
 0x1f9   : > { %v5074_v0 = vpop.f32.mrb[0].mxu0 }
 0x1fa   : > { %v1600_v1 = vadd.f32 %v5074_v0, %v6078_v62  ;;  %v1552_v2 = vpop.f32.mrb[1].mxu0 }
 0x1fb   : > { %v1598_v3 = vadd.f32 %v6078_v62, %v1552_v2  ;;  %v5075_v4 = vpop.f32.mrb[2].mxu0 }
 0x1fc   : > { %v1608_v6 = vmax.f32 %v1600_v1, 0.0  ;;  %v1601_v7 = vadd.f32 %v5075_v4, %v6078_v62  ;;  %v1555_v8 = vpop.f32.mrb[3].mxu0 }
 0x1fd   : > { %v1606_v10 = vmax.f32 %v1598_v3, 0.0  ;;  %v1599_v11 = vadd.f32 %v6078_v62, %v1555_v8 }
 0x1fe   : > { %v4599_v12 = vpack.c.bf16 %v1608_v6, %v1608_v6  ;;  %v1609_v13 = vmax.f32 %v1601_v7, 0.0 }
 0x1ff   : > { %v4597_v23 = vpack.c.bf16 %v1606_v10, %v1606_v10  ;;  %v1607_v32 = vmax.f32 %v1599_v11, 0.0 }
 0x200   : > { %v1683_v16 = vshrl.u32 %v4599_v12, 16  ;;  %v4600_v17 = vpack.c.bf16 %v1609_v13, %v1609_v13  ;;  %v1686_v33 = vshll.u32 %v4599_v12, 16  ;;  %v1789_v13 = vld [vmem:[#allocation2 + $0x38] sm:$0xf] }
 0x201   : > { %v1667_v35 = vshrl.u32 %v4597_v23, 16  ;;  %v1670_v39 = vshll.u32 %v4597_v23, 16  ;;  %v4598_v22 = vpack.c.bf16 %v1607_v32, %v1607_v32  ;;  %v5078_v40 = vpop.f32.mrb[4].mxu0 }
 0x202   : > { %v1685_v24 = vrot.slane %v1683_v16, 7  ;;  %v1691_v27 = vshrl.u32 %v4600_v17, 16  ;;  %v1694_v28 = vshll.u32 %v4600_v17, 16  ;;  %v1604_v29 = vadd.f32 %v5078_v40, %v6078_v62  ;;  %v1568_v30 = vpop.f32.mrb[5].mxu0 }
 0x203   : > { %v1669_v36 = vrot.slane %v1667_v35, 7  ;;  %v1675_v38 = vshrl.u32 %v4598_v22, 16  ;;  %v1678_v41 = vshll.u32 %v4598_v22, 16  ;;  %v1602_v42 = vadd.f32 %v6078_v62, %v1568_v30  ;;  %v5079_v20 = vpop.f32.mrb[6].mxu0  ;;  %v1777_v35 = vld [vmem:[#allocation2 + $0x28] sm:$0xf] }
 0x204   : > { %v1688_v44 = vor.u32 %v1686_v33, %v1685_v24  ;;  %v1689_v45 = vrot.slane %v1685_v24, 4  ;;  %v1693_v43 = vrot.slane %v1691_v27, 7  ;;  %v1612_v46 = vmax.f32 %v1604_v29, 0.0  ;;  %v1571_v47 = vpop.f32.mrb[7].mxu0  ;;  %v1792_v33 = vld [vmem:[#allocation2 + $0x3c] sm:$0x1] }
 0x205   : > { %v1672_v48 = vor.u32 %v1670_v39, %v1669_v36  ;;  %v1673_v49 = vrot.slane %v1669_v36, 4  ;;  %v1677_v53 = vrot.slane %v1675_v38, 7  ;;  %v1610_v56 = vmax.f32 %v1602_v42, 0.0  ;;  %v1780_v39 = vld [vmem:[#allocation2 + $0x2c] sm:$0x1] }
 0x206   : > { %v1766_v52 = vsel %vm6097_vm4, %v1688_v44, %v1765_v34  ;;  %v1769_v54 = vsel %vm6104_vm5, %v1689_v45, %v1768_v21  ;;  %v1696_v55 = vor.u32 %v1694_v28, %v1693_v43  ;;  %v1697_v59 = vrot.slane %v1693_v43, 4  ;;  %v1798_v44 = vld [vmem:[#allocation2 + $0x44] sm:$0x1]  ;;  %v1783_v45 = vld [vmem:[#allocation2 + $0x30] sm:$0xf] }
 0x207   : > { %1767 = vst [vmem:[#allocation2 + $0x18] sm:$0xf] %v1766_v52  ;;  %1770 = vst [vmem:[#allocation2 + $0x1c] sm:$0x1] %v1769_v54  ;;  %v1751_v58 = vsel %vm6097_vm4, %v1672_v48, %v1750_v26  ;;  %v1757_v0 = vsel %vm6104_vm5, %v1673_v49, %v1756_v37  ;;  %v1680_v1 = vor.u32 %v1678_v41, %v1677_v53  ;;  %v1681_v2 = vrot.slane %v1677_v53, 4 }
 0x208   : > { %1752 = vst [vmem:[#allocation2 + $0x8] sm:$0xf] %v1751_v58  ;;  %1758 = vst [vmem:[#allocation2 + $0xc] sm:$0x1] %v1757_v0  ;;  %v1772_v3 = vsel %vm6097_vm4, %v1696_v55, %v1771_v51  ;;  %v1775_v4 = vsel %vm6104_vm5, %v1697_v59, %v1774_v50  ;;  %v4603_v5 = vpack.c.bf16 %v1612_v46, %v1612_v46  ;;  %v6131_v24 = vrot.slane %v1846_v19, 5 }
 0x209   : > { %v4601_v6 = vpack.c.bf16 %v1610_v56, %v1610_v56  ;;  %1773 = vst [vmem:[#allocation2 + $0x20] sm:$0xf] %v1772_v3  ;;  %1776 = vst [vmem:[#allocation2 + $0x24] sm:$0x1] %v1775_v4  ;;  %v1760_v7 = vsel %vm6097_vm4, %v1680_v1, %v1759_v60  ;;  %v1763_v8 = vsel %vm6104_vm5, %v1681_v2, %v1762_v57  ;;  %v1786_v50 = vld [vmem:[#allocation2 + $0x34] sm:$0x1] }
 0x20a   : > { %v1605_v9 = vadd.f32 %v5079_v20, %v6078_v62  ;;  %v1603_v10 = vadd.f32 %v6078_v62, %v1571_v47  ;;  %1761 = vst [vmem:[#allocation2 + $0x10] sm:$0xf] %v1760_v7  ;;  %1764 = vst [vmem:[#allocation2 + $0x14] sm:$0x1] %v1763_v8  ;;  %v1715_v11 = vshrl.u32 %v4603_v5, 16  ;;  %v1718_v17 = vshll.u32 %v4603_v5, 16 }
 0x20b   : > { %v1699_v12 = vshrl.u32 %v4601_v6, 16  ;;  %v1702_v21 = vshll.u32 %v4601_v6, 16  ;;  %v1843_v62 = vor.u32 %v6092_v18, %v6090_v15  ;;  %v1795_v20 = vld [vmem:[#allocation2 + $0x40] sm:$0xf] }
 0x20c   : > { %v1613_v23 = vmax.f32 %v1605_v9, 0.0  ;;  %v1611_v32 = vmax.f32 %v1603_v10, 0.0  ;;  %v1717_v16 = vrot.slane %v1715_v11, 7  ;;  %v5638_v1 = vld [vmem:[%s6680_s3 + $0x220] sm:$0xff]  }
 0x20d   : > { %v1701_v34 = vrot.slane %v1699_v12, 7  ;;  %v1844_v53 = vrot.slane %v1843_v62, 4 }
 0x20e   : > { %v4604_v22 = vpack.c.bf16 %v1613_v23, %v1613_v23  ;;  %v4602_v40 = vpack.c.bf16 %v1611_v32, %v1611_v32  ;;  %v1720_v26 = vor.u32 %v1718_v17, %v1717_v16  ;;  %v1721_v27 = vrot.slane %v1717_v16, 4  ;;  %v6152_v58 = vld [vmem:[#allocation2 + $0x18] sm:$0xf]  ;;  %v6170_v9 = vld [vmem:[#allocation2 + $0x1c] sm:$0x1] }
 0x20f   : > { %v1704_v28 = vor.u32 %v1702_v21, %v1701_v34  ;;  %v1705_v29 = vrot.slane %v1701_v34, 4  ;;  %v6133_v41 = vld [vmem:[#allocation2 + $0x8] sm:$0xf]  ;;  %v6143_v43 = vld [vmem:[#allocation2 + $0xc] sm:$0x1]  ;;  %v1849_v25 = vsel %vm6158_vm8, %v1844_v53, %v6131_v24  ;;  %v1882_v32 = vshll.u32 %v6152_v58, 16 }
 0x210   : > { %v1723_v30 = vshrl.u32 %v4604_v22, 16  ;;  %v1726_v36 = vshll.u32 %v4604_v22, 16  ;;  %v1707_v37 = vshrl.u32 %v4602_v40, 16  ;;  %v1710_v38 = vshll.u32 %v4602_v40, 16  ;;  %v6174_v23 = vld [vmem:[#allocation2 + $0x20] sm:$0xf] }
 0x211   : > { %v1790_v42 = vsel %vm6097_vm4, %v1720_v26, %v1789_v13  ;;  %v1793_v15 = vsel %vm6104_vm5, %v1721_v27, %v1792_v33  ;;  %v1778_v18 = vsel %vm6097_vm4, %v1704_v28, %v1777_v35  ;;  %v1781_v19 = vsel %vm6104_vm5, %v1705_v29, %v1780_v39  ;;  %v6147_v49 = vld [vmem:[#allocation2 + $0x10] sm:$0xf]  ;;  %v6154_v0 = vld [vmem:[#allocation2 + $0x14] sm:$0x1]  ;;  %v6187_v26 = vld [vmem:[#allocation2 + $0x24] sm:$0x1] }
 0x212   : > { %1791 = vst [vmem:[#allocation2 + $0x38] sm:$0xf] %v1790_v42  ;;  %1794 = vst [vmem:[#allocation2 + $0x3c] sm:$0x1] %v1793_v15  ;;  %v1725_v51 = vrot.slane %v1723_v30, 7  ;;  %v1709_v46 = vrot.slane %v1707_v37, 7 }
 0x213   : > { %1779 = vst [vmem:[#allocation2 + $0x28] sm:$0xf] %v1778_v18  ;;  %1782 = vst [vmem:[#allocation2 + $0x2c] sm:$0x1] %v1781_v19  ;;  %v1851_v47 = vshrl.u32 %v6133_v41, 16  ;;  %v1854_v48 = vshll.u32 %v6133_v41, 16 }
 0x214   : > { %v1860_v56 = vshll.u32 %v6143_v43, 16  ;;  %v1865_v52 = vshrl.u32 %v6147_v49, 16  ;;  %v1868_v54 = vshll.u32 %v6147_v49, 16  ;;  %v1728_v55 = vor.u32 %v1726_v36, %v1725_v51 }
 0x215   : > { %v1729_v59 = vrot.slane %v1725_v51, 4  ;;  %v1712_v60 = vor.u32 %v1710_v38, %v1709_v46  ;;  %v1713_v57 = vrot.slane %v1709_v46, 4  ;;  %v1853_v2 = vrot.slane %v1851_v47, 4  ;;  %v5563_v46 = vld [vmem:[%s6680_s3 + $0x8] sm:$0xff]  }
 0x216   : > { %v1856_v3 = vrot.slane %v1854_v48, 5  ;;  %v1867_v4 = vrot.slane %v1865_v52, 4  ;;  %v1796_v5 = vsel %vm6097_vm4, %v1728_v55, %v1795_v20  ;;  %v1870_v11 = vrot.slane %v1868_v54, 5 }
 0x217   : > { %v1799_v6 = vsel %vm6104_vm5, %v1729_v59, %v1798_v44  ;;  %v1784_v7 = vsel %vm6097_vm4, %v1712_v60, %v1783_v45  ;;  %v1787_v8 = vsel %vm6104_vm5, %v1713_v57, %v1786_v50  ;;  %1797 = vst [vmem:[#allocation2 + $0x40] sm:$0xf] %v1796_v5  ;;  %v1874_v12 = vshll.u32 %v6154_v0, 16  ;;  %v2233_v59 = vld [vmem:[#allocation2 + $0x10] sm:$0xe] }
 0x218   : > { %1800 = vst [vmem:[#allocation2 + $0x44] sm:$0x1] %v1799_v6  ;;  %1785 = vst [vmem:[#allocation2 + $0x30] sm:$0xf] %v1784_v7  ;;  %v1857_v10 = vor.u32 %v1856_v3, %v1853_v2  ;;  %v1879_v13 = vshrl.u32 %v6152_v58, 16  ;;  %v1862_v31 = vrot.slane %v1860_v56, 5  ;;  %v1871_v17 = vor.u32 %v1870_v11, %v1867_v4 }
 0x219   : > { %1788 = vst [vmem:[#allocation2 + $0x34] sm:$0x1] %v1787_v8  ;;  %v1888_v34 = vshll.u32 %v6170_v9, 16  ;;  %v1884_v35 = vrot.slane %v1882_v32, 5  ;;  %v1893_v39 = vshrl.u32 %v6174_v23, 16  ;;  %v1896_v22 = vshll.u32 %v6174_v23, 16 }
 0x21a   : > { %v1858_v16 = vrot.slane %v1857_v10, 4  ;;  %v1881_v33 = vrot.slane %v1879_v13, 4  ;;  %v6181_v21 = vld [vmem:[#allocation2 + $0x28] sm:$0xf]  ;;  %v1872_v62 = vrot.slane %v1871_v17, 4  ;;  %v1876_v24 = vrot.slane %v1874_v12, 5 }
 0x21b   : > { %v1907_v27 = vshrl.u32 %v6181_v21, 16  ;;  %v6190_v30 = vld [vmem:[#allocation2 + $0x2c] sm:$0x1]  ;;  %v1895_v36 = vrot.slane %v1893_v39, 4  ;;  %v1898_v37 = vrot.slane %v1896_v22, 5  ;;  %v1890_v38 = vrot.slane %v1888_v34, 5 }
 0x21c   : > { %v1863_v40 = vsel %vm6158_vm8, %v1858_v16, %v1862_v31  ;;  %v1885_v29 = vor.u32 %v1884_v35, %v1881_v33  ;;  %v1910_v15 = vshll.u32 %v6181_v21, 16  ;;  %v6193_v18 = vld [vmem:[#allocation2 + $0x38] sm:$0xf]  ;;  %v1877_v19 = vsel %vm6158_vm8, %v1872_v62, %v1876_v24  ;;  %v1832_v2 = vld [vmem:[#allocation2 + $0x3c] sm:$0x1]  ;;  %v5564_v33 = vld [vmem:[%s6680_s3 + $0x10] sm:$0xff]  }
 0x21d   : > { %v4325_v28 = vcombine.low %v1849_v25, %v1863_v40  ;;  %v1909_v42 = vrot.slane %v1907_v27, 4  ;;  %v1899_v44 = vor.u32 %v1898_v37, %v1895_v36  ;;  %v1902_v45 = vshll.u32 %v6187_v26, 16  ;;  %v2234_v5 = vld [vmem:[#allocation2 + $0x18] sm:$0xe] }
 0x21e   : > { %v1886_v20 = vrot.slane %v1885_v29, 4  ;;  %v1912_v47 = vrot.slane %v1910_v15, 5  ;;  %v1916_v48 = vshll.u32 %v6190_v30, 16  ;;  %v1935_v55 = vshrl.u32 %v6193_v18, 16  ;;  %v2238_v27 = vld [vmem:[#allocation2 + $0x38] sm:$0xe] }
 0x21f   : > { %5096 = vmatprep.mubr.bf16.mxu1 %v4325_v28  ;;  %v6198_v51 = vld [vmem:[#allocation2 + $0x30] sm:$0xf]  ;;  %v1900_v54 = vrot.slane %v1899_v44, 4  ;;  %v2268_v6 = vrot.slane %v6154_v0, 5  ;;  %v1938_v10 = vshll.u32 %v6193_v18, 16  ;;  %v1904_v11 = vrot.slane %v1902_v45, 5 }
 0x220   : > { %v1831_v50 = vld [vmem:[#allocation2 + $0x34] sm:$0x1]  ;;  %v1921_v53 = vshrl.u32 %v6198_v51, 16  ;;  %v1924_v56 = vshll.u32 %v6198_v51, 16  ;;  %v1891_v52 = vsel %vm6158_vm8, %v1886_v20, %v1890_v38  ;;  %v1913_v57 = vor.u32 %v1912_v47, %v1909_v42  ;;  %v2237_v62 = vld [vmem:[#allocation2 + $0x30] sm:$0xe] }
 0x221   : > { %v4326_v60 = vcombine.low %v1877_v19, %v1891_v52  ;;  %v1930_v7 = vshll.u32 %v1831_v50, 16  ;;  %v1937_v8 = vrot.slane %v1935_v55, 4  ;;  %v1918_v13 = vrot.slane %v1916_v48, 5  ;;  %v5566_v38 = vld [vmem:[%s6680_s3 + $0x18] sm:$0xff]   ;;  %v2231_v55 = vld [vmem:[#allocation2] sm:$0xe] }
 0x222   : > { %v1923_v3 = vrot.slane %v1921_v53, 4  ;;  %v1926_v4 = vrot.slane %v1924_v56, 5  ;;  %v1914_v12 = vrot.slane %v1913_v57, 4  ;;  %v2272_v31 = vrot.slane %v6170_v9, 5  ;;  %v5570_v52 = vld [vmem:[%s6680_s3 + $0x38] sm:$0xff]   ;;  %v5574_v57 = vld [vmem:[%s6680_s3 + $0x88] sm:$0xff]  }
 0x223   : > { %5097 = vmatmul.mubr.bf16.vlgmr.msra.gmra.mrb[0].mxu1 %v4326_v60  ;;  %v1940_v32 = vrot.slane %v1938_v10, 5  ;;  %v1944_v16 = vshll.u32 %v1832_v2, 16  ;;  %v1905_v17 = vsel %vm6158_vm8, %v1900_v54, %v1904_v11  ;;  %v1932_v39 = vrot.slane %v1930_v7, 5  ;;  %v5572_v54 = vld [vmem:[%s6680_s3 + $0x80] sm:$0xff]   ;;  %v5581_v10 = vld [vmem:[%s6680_s3 + $0xb8] sm:$0xff]   ;;  %v4575_v9 = vld [vmem:[%s5719_s8 + $0x210] sm:$0xff] }
 0x224   : > { %v1927_v25 = vor.u32 %v1926_v4, %v1923_v3  ;;  %5105 = vmatpush3.bf16.msra.mxu1 %v6072_v61  ;;  %v1919_v0 = vsel %vm6158_vm8, %v1914_v12, %v1918_v13  ;;  %v4351_v61 = vrot.slane %v2233_v59, 9  ;;  %v4352_v40 = vrot.slane %v2234_v5, 9  ;;  %v2232_v59 = vld [vmem:[#allocation2 + $0x8] sm:$0xe]  ;;  %v5578_v7 = vld [vmem:[%s6680_s3 + $0xa0] sm:$0xff]  }
 0x225   : > { %5106 = vmatprep.subr.bf16.mxu1 %v5563_v46  ;;  %v4327_v35 = vcombine.low %v1905_v17, %v1919_v0  ;;  %v1941_v22 = vor.u32 %v1940_v32, %v1937_v8  ;;  %v1946_v36 = vrot.slane %v1944_v16, 5  ;;  %v4355_v15 = vrot.slane %v2237_v62, 9  ;;  %v2236_v8 = vld [vmem:[#allocation2 + $0x28] sm:$0xe]  ;;  %v2235_v11 = vld [vmem:[#allocation2 + $0x20] sm:$0xe] }
 0x226   : > { %v1928_v34 = vrot.slane %v1927_v25, 4  ;;  %v6228_v24 = vsel %vm6222_vm11, %v4351_v61, %v2268_v6  ;;  %v6234_v37 = vsel %vm6222_vm11, %v4352_v40, %v2272_v31  ;;  %v2284_v19 = vrot.slane %v1831_v50, 5  ;;  %v5567_v50 = vld [vmem:[%s6680_s3 + $0x20] sm:$0xff]   ;;  %v2614_v40 = vld [vmem:[#allocation2 + $0x8] sm:$0xf] }
 0x227   : > { %5100 = vmatprep.mubr.bf16.mxu1 %v4327_v35  ;;  %v1942_v29 = vrot.slane %v1941_v22, 4  ;;  %v4374_v42 = vcombine.low %v6228_v24, %v6234_v37  ;;  %v4356_v44 = vrot.slane %v2238_v27, 9  ;;  %v2288_v45 = vrot.slane %v1832_v2, 5  ;;  %v5582_v25 = vld [vmem:[%s6680_s3 + $0xc0] sm:$0xff]   ;;  %v5588_v35 = vld [vmem:[%s6680_s3 + $0xe8] sm:$0xff]   ;;  %v5589_v22 = vld [vmem:[%s6680_s3 + $0xf0] sm:$0xff]  }
 0x228   : > { %5107 = vmatpush3.bf16.msra.mxu1 %v5563_v46  ;;  %v1933_v28 = vsel %vm6158_vm8, %v1928_v34, %v1932_v39  ;;  %v6245_v47 = vsel %vm6222_vm11, %v4355_v15, %v2284_v19  ;;  %v4337_v48 = vcombine.low %v6080_v63, %v6133_v41  ;;  %v5568_v63 = vld [vmem:[%s6680_s3 + $0x28] sm:$0xff]   ;;  %v5569_v41 = vld [vmem:[%s6680_s3 + $0x30] sm:$0xff]   ;;  %v4338_v60 = vcombine.low %v6147_v49, %v6152_v58  ;;  %v5587_v61 = vld [vmem:[%s6680_s3 + $0xe0] sm:$0xff]  }
 0x229   : > { %5108 = vmatprep.subr.bf16.mxu1 %v5564_v33  ;;  %v1947_v20 = vsel %vm6158_vm8, %v1942_v29, %v1946_v36  ;;  %v6251_v53 = vsel %vm6222_vm11, %v4356_v44, %v2288_v45  ;;  %v4339_v2 = vcombine.low %v6174_v23, %v6181_v21  ;;  %v2260_v3 = vrot.slane %v6088_v14, 5  ;;  %v5576_v49 = vld [vmem:[%s6680_s3 + $0x90] sm:$0xff]   ;;  %v5590_v27 = vld [vmem:[%s6680_s3 + $0xf8] sm:$0xff]   ;;  %v6344_v44 = vld [vmem:[#allocation2 + $0xc] sm:$0x1] }
 0x22a   : > { %v4328_v46 = vcombine.low %v1933_v28, %v1947_v20  ;;  %v4376_v56 = vcombine.low %v6245_v47, %v6251_v53  ;;  %v2264_v4 = vrot.slane %v6143_v43, 5  ;;  %v4349_v5 = vrot.slane %v2231_v55, 9  ;;  %v5577_v43 = vld [vmem:[%s6680_s3 + $0x98] sm:$0xff]   ;;  %v5585_v34 = vld [vmem:[#allocation2 + $0x8] ss:$8 sps:$4 sm:$0xff]  }
 0x22b   : > { %v4350_v6 = vrot.slane %v2232_v59, 9  ;;  %v4340_v14 = vcombine.low %v6198_v51, %v6193_v18  ;;  %v5579_v18 = vld [vmem:[%s6680_s3 + $0xa8] sm:$0xff]   ;;  %v5580_v51 = vld [vmem:[%s6680_s3 + $0xb0] sm:$0xff]   ;;  %v4354_v12 = vrot.slane %v2236_v8, 9  ;;  %v2280_v13 = vrot.slane %v6190_v30, 5 }
 0x22c   : > { %5109 = vmatpush3.bf16.msra.mxu1 %v5564_v33  ;;  %v2261_v58 = vsel %vm6222_vm11, %v4349_v5, %v2260_v3  ;;  %v4353_v31 = vrot.slane %v2235_v11, 9  ;;  %v2276_v32 = vrot.slane %v6187_v26, 5  ;;  %v5583_v30 = vld [vmem:[%s6680_s3 + $0xc8] sm:$0xff]   ;;  %v5584_v26 = vld [vmem:[%s6680_s3 + $0xd0] sm:$0xff]   ;;  %v5586_v33 = vld [vmem:[%s6680_s3 + $0xd8] sm:$0xff]   ;;  %v2631_v28 = vshrl.u32 %v2614_v40, 16 }
 0x22d   : > { %5101 = vmatmul.mubr.bf16.gmra.mrb[4].mxu1 %v4328_v46  ;;  %5110 = vmatprep.subr.bf16.mxu1 %v5566_v38  ;;  %v2265_v23 = vsel %vm6222_vm11, %v4350_v6, %v2264_v4  ;;  %v2281_v16 = vsel %vm6222_vm11, %v4354_v12, %v2280_v13  ;;  %v2616_v39 = vld [vmem:[#allocation2 + $0x10] sm:$0xf]  ;;  %v2634_v29 = vshll.u32 %v2614_v40, 16  ;;  %v6342_v19 = vld [vmem:[#allocation2 + $0x14] sm:$0x1]  ;;  %v5594_v46 = vld [vmem:[%s6680_s3 + $0x108] sm:$0xff]  }
 0x22e   : > { %5120 = vmatprep.mubr.bf16.mxu1 %v4337_v48  ;;  %v4373_v21 = vcombine.low %v2261_v58, %v2265_v23  ;;  %v2277_v17 = vsel %vm6222_vm11, %v4353_v31, %v2276_v32  ;;  %v2645_v62 = vshrl.u32 %v2616_v39, 16  ;;  %v2648_v24 = vshll.u32 %v2616_v39, 16  ;;  %v5591_v45 = vld [vmem:[#allocation2 + $0x18] ss:$8 sps:$4 sm:$0xff]   ;;  %v5593_v53 = vld [vmem:[#allocation2 + $0x28] ss:$8 sps:$4 sm:$0xff]  }
 0x22f   : > { %v4375_v0 = vcombine.low %v2277_v17, %v2281_v16  ;;  %v2636_v15 = vrot.slane %v2634_v29, 5  ;;  %v2654_v48 = vshll.u32 %v6342_v19, 16  ;;  %v6363_v55 = vld [vmem:[%s6681_s4 + $0x8] sm:$0xff]   ;;  %v5597_v3 = vld [vmem:[%s6680_s3 + $0x118] sm:$0xff]   ;;  %v2620_v5 = vld [vmem:[#allocation2 + $0x20] sm:$0xf] }
 0x230   : > { %5111 = vmatpush3.bf16.msra.mxu1 %v5566_v38  ;;  %v2647_v36 = vrot.slane %v2645_v62, 4  ;;  %v2650_v37 = vrot.slane %v2648_v24, 5  ;;  %v5592_v38 = vld [vmem:[%s6680_s3 + $0x100] sm:$0xff]   ;;  %v6378_v6 = vld [vmem:[%s6681_s4 + $0x10] sm:$0xff]   ;;  %v2618_v23 = vld [vmem:[#allocation2 + $0x18] sm:$0xf] }
 0x231   : > { %5112 = vmatprep.subr.bf16.mxu1 %v5567_v50  ;;  %v5598_v58 = vld [vmem:[%s6680_s3 + $0x120] sm:$0xff]   ;;  %v2659_v8 = vshrl.u32 %v2618_v23, 16  ;;  %v5599_v11 = vld [vmem:[%s6680_s3 + $0x128] sm:$0xff]   ;;  %v2626_v39 = vld [vmem:[#allocation2 + $0x38] sm:$0xf] }
 0x232   : > { %v2651_v20 = vor.u32 %v2650_v37, %v2647_v36  ;;  %v6411_v62 = vld [vmem:[#allocation2 + $0x34] sm:$0x1] }
 0x234   : > { %5113 = vmatpush3.bf16.msra.mxu1 %v5567_v50  ;;  %v2640_v50 = vshll.u32 %v6344_v44, 16 }
 0x235   : > { %5114 = vmatprep.subr.bf16.mxu1 %v5568_v63 }
 0x236   : > { %v2642_v59 = vrot.slane %v2640_v50, 5 }
 0x238   : > { %5115 = vmatpush3.bf16.msra.mxu1 %v5568_v63  ;;  %v6354_v63 = vld [vmem:[%s6681_s4] sm:$0xff]  }
 0x239   : > { %5116 = vmatprep.subr.bf16.mxu1 %v5569_v41  ;;  %5296 = vmatprep.subr.bf16.mxu0 %v6354_v63 }
 0x23a   : > { %5297 = vmatpush3.bf16.msra.mxu0 %v6354_v63 }
 0x23b   : > { %5298 = vmatprep.subr.bf16.mxu0 %v6363_v55 }
 0x23c   : > { %5117 = vmatpush3.bf16.msra.mxu1 %v5569_v41  ;;  %v5596_v41 = vld [vmem:[%s6680_s3 + $0x110] sm:$0xff]  }
 0x23d   : > { %5118 = vmatprep.subr.bf16.mxu1 %v5570_v52 }
 0x23e   : > { %5299 = vmatpush3.bf16.msra.mxu0 %v6363_v55 }
 0x23f   : > { %5300 = vmatprep.subr.bf16.mxu0 %v6378_v6 }
 0x240   : > { %5119 = vmatpush3.bf16.msra.mxu1 %v5570_v52 }
 0x241   : > { %5128 = vmatprep.subr.bf16.mxu1 %v5572_v54 }
 0x242   : > { %5301 = vmatpush3.bf16.msra.mxu0 %v6378_v6 }
 0x243   : > { %5121 = vmatmul.mubr.bf16.vlgmr.msra.gmra.mrb[0].mxu1 %v4338_v60 }
 0x244   : > { %5124 = vmatprep.mubr.bf16.mxu1 %v4339_v2  ;;  %5129 = vmatpush3.bf16.msra.mxu1 %v5572_v54  ;;  %v2656_v54 = vrot.slane %v2654_v48, 5 }
 0x245   : > { %5130 = vmatprep.subr.bf16.mxu1 %v5574_v57 }
 0x248   : > { %5131 = vmatpush3.bf16.msra.mxu1 %v5574_v57  ;;  %v5595_v57 = vld [vmem:[#allocation2 + $0x38] ss:$8 sps:$4 sm:$0xff]  }
 0x249   : > { %5132 = vmatprep.subr.bf16.mxu1 %v5576_v49 }
 0x24b   : > { %5125 = vmatmul.mubr.bf16.gmra.mrb[4].mxu1 %v4340_v14  ;;  %v6387_v14 = vld [vmem:[%s6681_s4 + $0x18] sm:$0xff]  }
 0x24c   : > { %5133 = vmatpush3.bf16.msra.mxu1 %v5576_v49  ;;  %5144 = vmatprep.mubr.bf16.mxu1 %v4373_v21  ;;  %v2624_v49 = vld [vmem:[#allocation2 + $0x30] sm:$0xf]  ;;  %v2676_v21 = vshll.u32 %v2620_v5, 16 }
 0x24d   : > { %5134 = vmatprep.subr.bf16.mxu1 %v5577_v43  ;;  %5302 = vmatprep.subr.bf16.mxu0 %v6387_v14 }
 0x24e   : > { %v2678_v32 = vrot.slane %v2676_v21, 5  ;;  %5303 = vmatpush3.bf16.msra.mxu0 %v6387_v14 }
 0x250   : > { %5135 = vmatpush3.bf16.msra.mxu1 %v5577_v43  ;;  %v2673_v43 = vshrl.u32 %v2620_v5, 16  ;;  %v6436_v5 = vld [vmem:[#allocation2 + $0x44] sm:$0x1] }
 0x251   : > { %5136 = vmatprep.subr.bf16.mxu1 %v5578_v7 }
 0x252   : > { %v2675_v31 = vrot.slane %v2673_v43, 4 }
 0x254   : > { %5137 = vmatpush3.bf16.msra.mxu1 %v5578_v7  ;;  %v2622_v7 = vld [vmem:[#allocation2 + $0x28] sm:$0xf]  ;;  %v2679_v40 = vor.u32 %v2678_v32, %v2675_v31 }
 0x255   : > { %5138 = vmatprep.subr.bf16.mxu1 %v5579_v18  ;;  %v2687_v12 = vshrl.u32 %v2622_v7, 16  ;;  %v2690_v13 = vshll.u32 %v2622_v7, 16 }
 0x258   : > { %5139 = vmatpush3.bf16.msra.mxu1 %v5579_v18  ;;  %v2701_v18 = vshrl.u32 %v2624_v49, 16 }
 0x259   : > { %5140 = vmatprep.subr.bf16.mxu1 %v5580_v51 }
 0x25a   : > { %v2703_v16 = vrot.slane %v2701_v18, 4  ;;  %v6448_v18 = vld [vmem:[#allocation2 + $0x3c] sm:$0x1] }
 0x25c   : > { %5141 = vmatpush3.bf16.msra.mxu1 %v5580_v51  ;;  %v2704_v51 = vshll.u32 %v2624_v49, 16  ;;  %v6441_v49 = vld [vmem:[%s6681_s4 + $0x38] sm:$0xff]  }
 0x25d   : > { %5142 = vmatprep.subr.bf16.mxu1 %v5581_v10 }
 0x25e   : > { %v2706_v17 = vrot.slane %v2704_v51, 5 }
 0x260   : > { %5143 = vmatpush3.bf16.msra.mxu1 %v5581_v10  ;;  %v2662_v10 = vshll.u32 %v2618_v23, 16  ;;  %v2707_v29 = vor.u32 %v2706_v17, %v2703_v16  ;;  %v5603_v16 = vld [vmem:[%s6680_s3 + $0x148] sm:$0xff]  }
 0x261   : > { %5152 = vmatprep.subr.bf16.mxu1 %v5582_v25 }
 0x263   : > { %5145 = vmatmul.mubr.bf16.vlgmr.msra.gmra.mrb[0].mxu1 %v4374_v42  ;;  %v2633_v42 = vrot.slane %v2631_v28, 4  ;;  %v6414_v28 = vld [vmem:[#allocation2 + $0x1c] sm:$0x1] }
 0x264   : > { %5148 = vmatprep.mubr.bf16.mxu1 %v4375_v0  ;;  %5153 = vmatpush3.bf16.msra.mxu1 %v5582_v25  ;;  %v6397_v25 = vld [vmem:[%s6681_s4 + $0x20] sm:$0xff]   ;;  %v2668_v48 = vshll.u32 %v6414_v28, 16 }
 0x265   : > { %5154 = vmatprep.subr.bf16.mxu1 %v5583_v30  ;;  %v2637_v47 = vor.u32 %v2636_v15, %v2633_v42  ;;  %5304 = vmatprep.subr.bf16.mxu0 %v6397_v25  ;;  %v6401_v0 = vld [vmem:[#allocation2 + $0x24] sm:$0x1]  ;;  %v2715_v42 = vshrl.u32 %v2626_v39, 16  ;;  %v2718_v15 = vshll.u32 %v2626_v39, 16  ;;  %v4571_v39 = vld [vmem:[%s5719_s8 + $0x1d0] sm:$0xff] }
 0x266   : > { %5305 = vmatpush3.bf16.msra.mxu0 %v6397_v25  ;;  %v2682_v37 = vshll.u32 %v6401_v0, 16 }
 0x267   : > { %v2638_v52 = vrot.slane %v2637_v47, 4  ;;  %v6427_v47 = vld [vmem:[%s6681_s4 + $0x30] sm:$0xff]  }
 0x268   : > { %5155 = vmatpush3.bf16.msra.mxu1 %v5583_v30  ;;  %v2628_v30 = vld [vmem:[#allocation2 + $0x40] sm:$0xf] }
 0x269   : > { %5156 = vmatprep.subr.bf16.mxu1 %v5584_v26  ;;  %v2643_v2 = vsel %vm6158_vm8, %v2638_v52, %v2642_v59  ;;  %v2729_v24 = vshrl.u32 %v2628_v30, 16  ;;  %v2708_v52 = vrot.slane %v2707_v29, 4  ;;  %v2684_v59 = vrot.slane %v2682_v37, 5 }
 0x26b   : > { %5149 = vmatmul.mubr.bf16.gmra.mrb[4].mxu1 %v4376_v56  ;;  %v2652_v56 = vrot.slane %v2651_v20, 4  ;;  %v5601_v20 = vld [vmem:[%s6680_s3 + $0x138] sm:$0xff]   ;;  %v2731_v50 = vrot.slane %v2729_v24, 4 }
 0x26c   : > { %5157 = vmatpush3.bf16.msra.mxu1 %v5584_v26  ;;  %5168 = vmatprep.mubr.bf16.mxu1 %v5585_v34  ;;  %v2661_v26 = vrot.slane %v2659_v8, 4  ;;  %v5600_v34 = vld [vmem:[%s6680_s3 + $0x130] sm:$0xff]  }
 0x26d   : > { %5158 = vmatprep.subr.bf16.mxu1 %v5586_v33  ;;  %v2657_v60 = vsel %vm6158_vm8, %v2652_v56, %v2656_v54 }
 0x26e   : > { %v4429_v4 = vcombine.low %v2643_v2, %v2657_v60  ;;  %v2717_v60 = vrot.slane %v2715_v42, 4  ;;  %v5602_v2 = vld [vmem:[%s6680_s3 + $0x140] sm:$0xff]   ;;  %v2922_v42 = vrot.slane %v6344_v44, 5  ;;  %v5605_v44 = vld [vmem:[%s6680_s3 + $0x158] sm:$0xff]  }
 0x270   : > { %5159 = vmatpush3.bf16.msra.mxu1 %v5586_v33  ;;  %v2664_v33 = vrot.slane %v2662_v10, 5  ;;  %v2738_v10 = vshll.u32 %v6436_v5, 16 }
 0x271   : > { %5160 = vmatprep.subr.bf16.mxu1 %v5587_v61 }
 0x272   : > { %v2665_v36 = vor.u32 %v2664_v33, %v2661_v26  ;;  %v2724_v26 = vshll.u32 %v6448_v18, 16 }
 0x274   : > { %5161 = vmatpush3.bf16.msra.mxu1 %v5587_v61  ;;  %v2689_v61 = vrot.slane %v2687_v12, 4  ;;  %v2666_v54 = vrot.slane %v2665_v36, 4  ;;  %v4569_v12 = vld [vmem:[%s5719_s8 + $0x1b0] sm:$0xff] }
 0x275   : > { %5162 = vmatprep.subr.bf16.mxu1 %v5588_v35  ;;  %v5604_v36 = vld [vmem:[%s6680_s3 + $0x150] sm:$0xff]  }
 0x278   : > { %5163 = vmatpush3.bf16.msra.mxu1 %v5588_v35  ;;  %v2692_v35 = vrot.slane %v2690_v13, 5  ;;  %v4570_v13 = vld [vmem:[%s5719_s8 + $0x1c0] sm:$0xff] }
 0x279   : > { %5164 = vmatprep.subr.bf16.mxu1 %v5589_v22  ;;  %v3777_v17 = vpack.c.bf16 %v4570_v13, %v4569_v12  ;;  %v2902_v12 = vld [vmem:[#allocation2 + $0x38] sm:$0xe] }
 0x27b   : > { %5312 = vmatprep.mubr.bf16.mxu0 %v3777_v17  ;;  %v2946_v17 = vrot.slane %v6448_v18, 5  ;;  %v5615_v18 = vld [vmem:[%s6680_s3 + $0x1a0] sm:$0xff]  }
 0x27c   : > { %5165 = vmatpush3.bf16.msra.mxu1 %v5589_v22  ;;  %v6409_v22 = vld [vmem:[%s6681_s4 + $0x28] sm:$0xff]  }
 0x27d   : > { %5166 = vmatprep.subr.bf16.mxu1 %v5590_v27  ;;  %5306 = vmatprep.subr.bf16.mxu0 %v6409_v22 }
 0x27e   : > { %5307 = vmatpush3.bf16.msra.mxu0 %v6409_v22 }
 0x27f   : > { %5308 = vmatprep.subr.bf16.mxu0 %v6427_v47 }
 0x280   : > { %5167 = vmatpush3.bf16.msra.mxu1 %v5590_v27  ;;  %v2732_v27 = vshll.u32 %v2628_v30, 16 }
 0x281   : > { %5176 = vmatprep.subr.bf16.mxu1 %v5592_v38 }
 0x282   : > { %v2734_v56 = vrot.slane %v2732_v27, 5  ;;  %5309 = vmatpush3.bf16.msra.mxu0 %v6427_v47  ;;  %v2740_v27 = vrot.slane %v2738_v10, 5  ;;  %v2903_v10 = vld [vmem:[#allocation2 + $0x40] sm:$0xe] }
 0x283   : > { %5169 = vmatmul.mubr.bf16.vlgmr.msra.gmra.mrb[0].mxu1 %v5591_v45  ;;  %v2693_v45 = vor.u32 %v2692_v35, %v2689_v61  ;;  %5310 = vmatprep.subr.bf16.mxu0 %v6441_v49  ;;  %v2926_v35 = vrot.slane %v6342_v19, 5 }
 0x284   : > { %5172 = vmatprep.mubr.bf16.mxu1 %v5593_v53  ;;  %5177 = vmatpush3.bf16.msra.mxu1 %v5592_v38  ;;  %v6418_v38 = vld [vmem:[#allocation2 + $0x2c] sm:$0x1]  ;;  %v2680_v53 = vrot.slane %v2679_v40, 4  ;;  %v2735_v43 = vor.u32 %v2734_v56, %v2731_v50  ;;  %v4572_v40 = vld [vmem:[%s5719_s8 + $0x1e0] sm:$0xff] }
 0x285   : > { %5178 = vmatprep.subr.bf16.mxu1 %v5594_v46  ;;  %v3778_v29 = vpack.c.bf16 %v4572_v40, %v4571_v39  ;;  %v5606_v50 = vld [vmem:[%s6680_s3 + $0x160] sm:$0xff]   ;;  %v5607_v56 = vld [vmem:[%s6680_s3 + $0x168] sm:$0xff]   ;;  %v3277_v39 = vld [vmem:[#allocation2 + $0x10] sm:$0xf] }
 0x286   : > { %v2685_v23 = vsel %vm6158_vm8, %v2680_v53, %v2684_v59  ;;  %v2736_v33 = vrot.slane %v2735_v43, 4  ;;  %5311 = vmatpush3.bf16.msra.mxu0 %v6441_v49  ;;  %v5609_v59 = vld [vmem:[%s6680_s3 + $0x178] sm:$0xff]   ;;  %v2930_v43 = vrot.slane %v6414_v28, 5  ;;  %v5617_v40 = vld [vmem:[%s6680_s3 + $0x1b0] sm:$0xff]  }
 0x288   : > { %5179 = vmatpush3.bf16.msra.mxu1 %v5594_v46  ;;  %v2710_v46 = vshll.u32 %v6411_v62, 16  ;;  %v2741_v19 = vsel %vm6158_vm8, %v2736_v33, %v2740_v27  ;;  %v3294_v27 = vshrl.u32 %v3277_v39, 16 }
 0x289   : > { %5180 = vmatprep.subr.bf16.mxu1 %v5596_v41  ;;  %5313 = vmatmul.mubr.bf16.vlgmr.msra.gmra.mrb[8].mxu0 %v3778_v29  ;;  %v3297_v29 = vshll.u32 %v3277_v39, 16 }
 0x28b   : > { %5173 = vmatmul.mubr.bf16.gmra.mrb[4].mxu1 %v5595_v57  ;;  %v2720_v57 = vrot.slane %v2718_v15, 5  ;;  %v2726_v15 = vrot.slane %v2724_v26, 5 }
 0x28c   : > { %5181 = vmatpush3.bf16.msra.mxu1 %v5596_v41  ;;  %5192 = vmatprep.mubr.bf16.mxu1 %v4429_v4  ;;  %v2696_v41 = vshll.u32 %v6418_v38, 16  ;;  %v2712_v4 = vrot.slane %v2710_v46, 5 }
 0x28d   : > { %5182 = vmatprep.subr.bf16.mxu1 %v5597_v3  ;;  %v2721_v8 = vor.u32 %v2720_v57, %v2717_v60  ;;  %v2898_v60 = vld [vmem:[#allocation2 + $0x18] sm:$0xe] }
 0x28e   : > { %v2698_v21 = vrot.slane %v2696_v41, 5  ;;  %v2713_v7 = vsel %vm6158_vm8, %v2708_v52, %v2712_v4  ;;  %v5608_v41 = vld [vmem:[%s6680_s3 + $0x170] sm:$0xff]   ;;  %v2899_v52 = vld [vmem:[#allocation2 + $0x20] sm:$0xe] }
 0x28f   : > { %v2722_v24 = vrot.slane %v2721_v8, 4  ;;  %v4444_v57 = vrot.slane %v2899_v52, 9 }
 0x290   : > { %5183 = vmatpush3.bf16.msra.mxu1 %v5597_v3  ;;  %v2694_v3 = vrot.slane %v2693_v45, 4 }
 0x291   : > { %5184 = vmatprep.subr.bf16.mxu1 %v5598_v58  ;;  %v2727_v45 = vsel %vm6158_vm8, %v2722_v24, %v2726_v15  ;;  %v3279_v24 = vld [vmem:[#allocation2 + $0x18] sm:$0xf]  ;;  %v3296_v15 = vrot.slane %v3294_v27, 4 }
 0x292   : > { %v2699_v32 = vsel %vm6158_vm8, %v2694_v3, %v2698_v21  ;;  %v4432_v46 = vcombine.low %v2727_v45, %v2741_v19  ;;  %v2900_v3 = vld [vmem:[#allocation2 + $0x28] sm:$0xe]  ;;  %v5610_v21 = vld [vmem:[%s6680_s3 + $0x180] sm:$0xff]   ;;  %v3299_v19 = vrot.slane %v3297_v29, 5 }
 0x293   : > { %v4431_v30 = vcombine.low %v2699_v32, %v2713_v7  ;;  %v4445_v7 = vrot.slane %v2900_v3, 9  ;;  %v2950_v32 = vrot.slane %v6436_v5, 5  ;;  %v5614_v5 = vld [vmem:[%s6680_s3 + $0x198] sm:$0xff]  }
 0x294   : > { %5185 = vmatpush3.bf16.msra.mxu1 %v5598_v58  ;;  %v2670_v58 = vrot.slane %v2668_v48, 5 }
 0x295   : > { %5186 = vmatprep.subr.bf16.mxu1 %v5599_v11 }
 0x296   : > { %v2671_v51 = vsel %vm6158_vm8, %v2666_v54, %v2670_v58  ;;  %v2901_v54 = vld [vmem:[#allocation2 + $0x30] sm:$0xe]  ;;  %v2942_v58 = vrot.slane %v6411_v62, 5 }
 0x297   : > { %v4430_v31 = vcombine.low %v2671_v51, %v2685_v23  ;;  %v4446_v4 = vrot.slane %v2901_v54, 9  ;;  %v4443_v23 = vrot.slane %v2898_v60, 9  ;;  %v2938_v51 = vrot.slane %v6418_v38, 5  ;;  %v5611_v38 = vld [vmem:[%s6680_s3 + $0x188] sm:$0xff]   ;;  %v5621_v54 = vld [vmem:[#allocation2 + $0x30] ss:$8 sps:$4 sm:$0xff]  }
 0x298   : > { %5187 = vmatpush3.bf16.msra.mxu1 %v5599_v11  ;;  %v2897_v11 = vld [vmem:[#allocation2 + $0x10] sm:$0xe] }
 0x299   : > { %5188 = vmatprep.subr.bf16.mxu1 %v5600_v34  ;;  %v4442_v61 = vrot.slane %v2897_v11, 9  ;;  %v2931_v62 = vsel %vm6222_vm11, %v4443_v23, %v2930_v43  ;;  %v2939_v11 = vsel %vm6222_vm11, %v4445_v7, %v2938_v51  ;;  %v5623_v23 = vld [vmem:[#allocation2 + $0x40] ss:$8 sps:$4 sm:$0xff]  }
 0x29a   : > { %v3283_v51 = vld [vmem:[#allocation2 + $0x28] sm:$0xf] }
 0x29c   : > { %5189 = vmatpush3.bf16.msra.mxu1 %v5600_v34  ;;  %v2896_v34 = vld [vmem:[#allocation2 + $0x8] sm:$0xe] }
 0x29d   : > { %5190 = vmatprep.subr.bf16.mxu1 %v5601_v20  ;;  %v4441_v37 = vrot.slane %v2896_v34, 9 }
 0x29f   : > { %v2923_v48 = vsel %vm6222_vm11, %v4441_v37, %v2922_v42  ;;  %v3308_v37 = vshrl.u32 %v3279_v24, 16  ;;  %v3311_v42 = vshll.u32 %v3279_v24, 16  ;;  %v6566_v24 = vld [vmem:[#allocation2 + $0x2c] sm:$0x1] }
 0x2a0   : > { %5191 = vmatpush3.bf16.msra.mxu1 %v5601_v20  ;;  %v2927_v20 = vsel %vm6222_vm11, %v4442_v61, %v2926_v35  ;;  %v5613_v61 = vld [vmem:[#allocation2 + $0x10] ss:$8 sps:$4 sm:$0xff]   ;;  %v5616_v35 = vld [vmem:[%s6680_s3 + $0x1a8] sm:$0xff]  }
 0x2a1   : > { %5200 = vmatprep.subr.bf16.mxu1 %v5602_v2  ;;  %v4465_v53 = vcombine.low %v2923_v48, %v2927_v20  ;;  %v5620_v20 = vld [vmem:[%s6680_s3 + $0x1c0] sm:$0xff]   ;;  %v3310_v45 = vrot.slane %v3308_v37, 4  ;;  %v6538_v48 = vld [vmem:[#allocation2 + $0x14] sm:$0x1] }
 0x2a3   : > { %5193 = vmatmul.mubr.bf16.vlgmr.msra.gmra.mrb[0].mxu1 %v4430_v31  ;;  %v4448_v31 = vrot.slane %v2903_v10, 9  ;;  %v3281_v10 = vld [vmem:[#allocation2 + $0x20] sm:$0xf] }
 0x2a4   : > { %5196 = vmatprep.mubr.bf16.mxu1 %v4431_v30  ;;  %5201 = vmatpush3.bf16.msra.mxu1 %v5602_v2  ;;  %v2934_v2 = vrot.slane %v6401_v0, 5  ;;  %v2943_v0 = vsel %vm6222_vm11, %v4446_v4, %v2942_v58  ;;  %v5612_v30 = vld [vmem:[%s6680_s3 + $0x190] sm:$0xff]  }
 0x2a5   : > { %5202 = vmatprep.subr.bf16.mxu1 %v5603_v16  ;;  %v4467_v13 = vcombine.low %v2939_v11, %v2943_v0  ;;  %v2951_v26 = vsel %vm6222_vm11, %v4448_v31, %v2950_v32  ;;  %v5626_v0 = vld [vmem:[%s6680_s3 + $0x1e0] sm:$0xff]   ;;  %v3287_v11 = vld [vmem:[#allocation2 + $0x38] sm:$0xf]  ;;  %v3325_v31 = vshll.u32 %v3281_v10, 16  ;;  %v5627_v32 = vld [vmem:[%s6680_s3 + $0x1e8] sm:$0xff]  }
 0x2a6   : > { %v2935_v8 = vsel %vm6222_vm11, %v4444_v57, %v2934_v2  ;;  %v5624_v57 = vld [vmem:[%s6680_s3 + $0x1d0] sm:$0xff]  }
 0x2a7   : > { %v4466_v28 = vcombine.low %v2931_v62, %v2935_v8  ;;  %v3285_v8 = vld [vmem:[#allocation2 + $0x30] sm:$0xf]  ;;  %v3336_v62 = vshrl.u32 %v3283_v51, 16 }
 0x2a8   : > { %5203 = vmatpush3.bf16.msra.mxu1 %v5603_v16  ;;  %v4447_v16 = vrot.slane %v2902_v12, 9  ;;  %v3353_v12 = vshll.u32 %v3285_v8, 16 }
 0x2a9   : > { %5204 = vmatprep.subr.bf16.mxu1 %v5604_v36 }
 0x2aa   : > { %v2947_v33 = vsel %vm6222_vm11, %v4447_v16, %v2946_v17  ;;  %v3364_v16 = vshrl.u32 %v3287_v11, 16  ;;  %v3367_v17 = vshll.u32 %v3287_v11, 16 }
 0x2ab   : > { %5197 = vmatmul.mubr.bf16.gmra.mrb[4].mxu1 %v4432_v46  ;;  %v4468_v34 = vcombine.low %v2947_v33, %v2951_v26  ;;  %v3313_v46 = vrot.slane %v3311_v42, 5  ;;  %v3338_v26 = vrot.slane %v3336_v62, 4  ;;  %v6568_v42 = vld [vmem:[#allocation2 + $0x34] sm:$0x1] }
 0x2ac   : > { %5205 = vmatpush3.bf16.msra.mxu1 %v5604_v36  ;;  %5216 = vmatprep.mubr.bf16.mxu1 %v4465_v53  ;;  %v5618_v36 = vld [vmem:[%s6680_s3 + $0x1b8] sm:$0xff]   ;;  %v3366_v27 = vrot.slane %v3364_v16, 4  ;;  %v3369_v29 = vrot.slane %v3367_v17, 5  ;;  %v3559_v16 = vld [vmem:[#allocation2 + $0x10] sm:$0xe] }
 0x2ad   : > { %5206 = vmatprep.subr.bf16.mxu1 %v5605_v44  ;;  %v6540_v53 = vld [vmem:[#allocation2 + $0x1c] sm:$0x1]  ;;  %v3314_v52 = vor.u32 %v3313_v46, %v3310_v45 }
 0x2ae   : > { %v3317_v60 = vshll.u32 %v6540_v53, 16 }
 0x2af   : > { %v3315_v3 = vrot.slane %v3314_v52, 4  ;;  %v3370_v52 = vor.u32 %v3369_v29, %v3366_v27  ;;  %v5634_v27 = vld [vmem:[%s6680_s3 + $0x210] sm:$0xff]  }
 0x2b0   : > { %5207 = vmatpush3.bf16.msra.mxu1 %v5605_v44  ;;  %v3300_v44 = vor.u32 %v3299_v19, %v3296_v15  ;;  %v3319_v58 = vrot.slane %v3317_v60, 5 }
 0x2b1   : > { %5208 = vmatprep.subr.bf16.mxu1 %v5606_v50 }
 0x2b2   : > { %v3320_v43 = vsel %vm6158_vm8, %v3315_v3, %v3319_v58 }
 0x2b4   : > { %5209 = vmatpush3.bf16.msra.mxu1 %v5606_v50  ;;  %v5619_v50 = vld [vmem:[#allocation2 + $0x20] ss:$8 sps:$4 sm:$0xff]  }
 0x2b5   : > { %5210 = vmatprep.subr.bf16.mxu1 %v5607_v56 }
 0x2b8   : > { %5211 = vmatpush3.bf16.msra.mxu1 %v5607_v56  ;;  %v5622_v56 = vld [vmem:[%s6680_s3 + $0x1c8] sm:$0xff]  }
 0x2b9   : > { %5212 = vmatprep.subr.bf16.mxu1 %v5608_v41 }
 0x2bc   : > { %5213 = vmatpush3.bf16.msra.mxu1 %v5608_v41  ;;  %v3303_v41 = vshll.u32 %v6538_v48, 16 }
 0x2bd   : > { %5214 = vmatprep.subr.bf16.mxu1 %v5609_v59 }
 0x2be   : > { %v3305_v2 = vrot.slane %v3303_v41, 5  ;;  %v3359_v41 = vshll.u32 %v6568_v42, 16 }
 0x2c0   : > { %5215 = vmatpush3.bf16.msra.mxu1 %v5609_v59  ;;  %v3301_v59 = vrot.slane %v3300_v44, 4  ;;  %v3345_v44 = vshll.u32 %v6566_v24, 16 }
 0x2c1   : > { %5224 = vmatprep.subr.bf16.mxu1 %v5610_v21 }
 0x2c2   : > { %v3306_v4 = vsel %vm6158_vm8, %v3301_v59, %v3305_v2 }
 0x2c3   : > { %5217 = vmatmul.mubr.bf16.vlgmr.msra.gmra.mrb[0].mxu1 %v4466_v28  ;;  %v4521_v7 = vcombine.low %v3306_v4, %v3320_v43  ;;  %v3339_v28 = vshll.u32 %v3283_v51, 16  ;;  %v3347_v43 = vrot.slane %v3345_v44, 5  ;;  %v3361_v51 = vrot.slane %v3359_v41, 5  ;;  %v5640_v44 = vld [vmem:[%s6680_s3 + $0x228] sm:$0xff]  }
 0x2c4   : > { %5220 = vmatprep.mubr.bf16.mxu1 %v4467_v13  ;;  %5225 = vmatpush3.bf16.msra.mxu1 %v5610_v21  ;;  %v5625_v21 = vld [vmem:[%s6680_s3 + $0x1d8] sm:$0xff]   ;;  %v3322_v13 = vshrl.u32 %v3281_v10, 16  ;;  %v3562_v41 = vld [vmem:[#allocation2 + $0x28] sm:$0xe] }
 0x2c5   : > { %5226 = vmatprep.subr.bf16.mxu1 %v5611_v38  ;;  %v3341_v33 = vrot.slane %v3339_v28, 5 }
 0x2c7   : > { %v3342_v37 = vor.u32 %v3341_v33, %v3338_v26  ;;  %v5632_v26 = vld [vmem:[%s6680_s3 + $0x208] sm:$0xff]  }
 0x2c8   : > { %5227 = vmatpush3.bf16.msra.mxu1 %v5611_v38  ;;  %v3350_v38 = vshrl.u32 %v3285_v8, 16  ;;  %v3371_v8 = vrot.slane %v3370_v52, 4  ;;  %v3563_v52 = vld [vmem:[#allocation2 + $0x30] sm:$0xe] }
 0x2c9   : > { %5228 = vmatprep.subr.bf16.mxu1 %v5612_v30 }
 0x2cb   : > { %5221 = vmatmul.mubr.bf16.gmra.mrb[4].mxu1 %v4468_v34  ;;  %v3352_v34 = vrot.slane %v3350_v38, 4 }
 0x2cc   : > { %5229 = vmatpush3.bf16.msra.mxu1 %v5612_v30  ;;  %5240 = vmatprep.mubr.bf16.mxu1 %v5613_v61  ;;  %v3291_v30 = vld [vmem:[#allocation2 + $0x48] sm:$0xf]  ;;  %v3289_v61 = vld [vmem:[#allocation2 + $0x40] sm:$0xf] }
 0x2cd   : > { %5230 = vmatprep.subr.bf16.mxu1 %v5614_v5  ;;  %v3392_v39 = vshrl.u32 %v3291_v30, 16  ;;  %v3378_v15 = vshrl.u32 %v3289_v61, 16  ;;  %v3381_v19 = vshll.u32 %v3289_v61, 16 }
 0x2cf   : > { %v3380_v2 = vrot.slane %v3378_v15, 4  ;;  %v3383_v3 = vrot.slane %v3381_v19, 5 }
 0x2d0   : > { %5231 = vmatpush3.bf16.msra.mxu1 %v5614_v5  ;;  %v3355_v5 = vrot.slane %v3353_v12, 5 }
 0x2d1   : > { %5232 = vmatprep.subr.bf16.mxu1 %v5615_v18  ;;  %v3384_v11 = vor.u32 %v3383_v3, %v3380_v2  ;;  %v3564_v2 = vld [vmem:[#allocation2 + $0x38] sm:$0xe]  ;;  %v4537_v3 = vrot.slane %v3563_v52, 9 }
 0x2d2   : > { %v3356_v45 = vor.u32 %v3355_v5, %v3352_v34 }
 0x2d3   : > { %v3385_v34 = vrot.slane %v3384_v11, 4 }
 0x2d4   : > { %5233 = vmatpush3.bf16.msra.mxu1 %v5615_v18  ;;  %v3324_v18 = vrot.slane %v3322_v13, 4  ;;  %v3357_v4 = vrot.slane %v3356_v45, 4 }
 0x2d5   : > { %5234 = vmatprep.subr.bf16.mxu1 %v5616_v35 }
 0x2d6   : > { %v3362_v12 = vsel %vm6158_vm8, %v3357_v4, %v3361_v51  ;;  %v3601_v4 = vrot.slane %v6568_v42, 5 }
 0x2d8   : > { %5235 = vmatpush3.bf16.msra.mxu1 %v5616_v35  ;;  %v3327_v35 = vrot.slane %v3325_v31, 5 }
 0x2d9   : > { %5236 = vmatprep.subr.bf16.mxu1 %v5617_v40 }
 0x2da   : > { %v3328_v46 = vor.u32 %v3327_v35, %v3324_v18  ;;  %v3560_v18 = vld [vmem:[#allocation2 + $0x18] sm:$0xe]  ;;  %v4533_v35 = vrot.slane %v3559_v16, 9 }
 0x2db   : > { %v4534_v29 = vrot.slane %v3560_v18, 9 }
 0x2dc   : > { %5237 = vmatpush3.bf16.msra.mxu1 %v5617_v40  ;;  %v5628_v40 = vld [vmem:[%s6680_s3 + $0x1f0] sm:$0xff]  }
 0x2dd   : > { %5238 = vmatprep.subr.bf16.mxu1 %v5618_v36 }
 0x2e0   : > { %5239 = vmatpush3.bf16.msra.mxu1 %v5618_v36  ;;  %v3395_v36 = vshll.u32 %v3291_v30, 16 }
 0x2e1   : > { %5248 = vmatprep.subr.bf16.mxu1 %v5620_v20 }
 0x2e2   : > { %v3397_v59 = vrot.slane %v3395_v36, 5  ;;  %v3589_v36 = vrot.slane %v6540_v53, 5 }
 0x2e3   : > { %5241 = vmatmul.mubr.bf16.vlgmr.msra.gmra.mrb[0].mxu1 %v5619_v50  ;;  %v6573_v50 = vld [vmem:[#allocation2 + $0x3c] sm:$0x1] }
 0x2e4   : > { %5244 = vmatprep.mubr.bf16.mxu1 %v5621_v54  ;;  %5249 = vmatpush3.bf16.msra.mxu1 %v5620_v20  ;;  %v6570_v20 = vld [vmem:[#allocation2 + $0x24] sm:$0x1]  ;;  %v3394_v54 = vrot.slane %v3392_v39, 4  ;;  %v3373_v58 = vshll.u32 %v6573_v50, 16  ;;  %v3585_v39 = vrot.slane %v6538_v48, 5  ;;  %v3590_v45 = vsel %vm6222_vm11, %v4534_v29, %v3589_v36 }
 0x2e5   : > { %5250 = vmatprep.subr.bf16.mxu1 %v5622_v56  ;;  %v3331_v60 = vshll.u32 %v6570_v20, 16 }
 0x2e6   : > { %v3398_v10 = vor.u32 %v3397_v59, %v3394_v54  ;;  %v3375_v13 = vrot.slane %v3373_v58, 5  ;;  %v3586_v48 = vsel %vm6222_vm11, %v4533_v35, %v3585_v39  ;;  %v5644_v54 = vld [vmem:[%s6680_s3 + $0x238] sm:$0xff]   ;;  %v3561_v59 = vld [vmem:[#allocation2 + $0x20] sm:$0xe] }
 0x2e7   : > { %v3333_v62 = vrot.slane %v3331_v60, 5  ;;  %v4557_v53 = vcombine.low %v3586_v48, %v3590_v45  ;;  %v4536_v60 = vrot.slane %v3562_v41, 9  ;;  %v4535_v58 = vrot.slane %v3561_v59, 9 }
 0x2e8   : > { %5251 = vmatpush3.bf16.msra.mxu1 %v5622_v56  ;;  %v5629_v56 = vld [vmem:[%s6680_s3 + $0x1f8] sm:$0xff]   ;;  %v3376_v30 = vsel %vm6158_vm8, %v3371_v8, %v3375_v13  ;;  %v3399_v5 = vrot.slane %v3398_v10, 4  ;;  %v3566_v8 = vld [vmem:[#allocation2 + $0x48] sm:$0xe]  ;;  %v3602_v10 = vsel %vm6222_vm11, %v4537_v3, %v3601_v4  ;;  %v4573_v13 = vld [vmem:[%s5719_s8 + $0x1f0] sm:$0xff] }
 0x2e9   : > { %5252 = vmatprep.subr.bf16.mxu1 %v5624_v57  ;;  %v4523_v33 = vcombine.low %v3362_v12, %v3376_v30 }
 0x2eb   : > { %5245 = vmatmul.mubr.bf16.gmra.mrb[4].mxu1 %v5623_v23  ;;  %v3329_v23 = vrot.slane %v3328_v46, 4  ;;  %v5636_v46 = vld [vmem:[%s6680_s3 + $0x218] sm:$0xff]  }
 0x2ec   : > { %5253 = vmatpush3.bf16.msra.mxu1 %v5624_v57  ;;  %5264 = vmatprep.mubr.bf16.mxu1 %v4521_v7  ;;  %v3343_v57 = vrot.slane %v3342_v37, 4  ;;  %v5630_v7 = vld [vmem:[%s6680_s3 + $0x200] sm:$0xff]  }
 0x2ed   : > { %5254 = vmatprep.subr.bf16.mxu1 %v5625_v21  ;;  %v3334_v31 = vsel %vm6158_vm8, %v3329_v23, %v3333_v62  ;;  %v3593_v23 = vrot.slane %v6570_v20, 5 }
 0x2ee   : > { %v3348_v28 = vsel %vm6158_vm8, %v3343_v57, %v3347_v43  ;;  %v3597_v57 = vrot.slane %v6566_v24, 5  ;;  %v4538_v43 = vrot.slane %v3564_v2, 9  ;;  %v3565_v24 = vld [vmem:[#allocation2 + $0x40] sm:$0xe] }
 0x2ef   : > { %v4522_v17 = vcombine.low %v3334_v31, %v3348_v28  ;;  %v3594_v42 = vsel %vm6222_vm11, %v4535_v58, %v3593_v23  ;;  %v4539_v11 = vrot.slane %v3565_v24, 9  ;;  %v4574_v31 = vld [vmem:[%s5719_s8 + $0x200] sm:$0xff] }
 0x2f0   : > { %5255 = vmatpush3.bf16.msra.mxu1 %v5625_v21  ;;  %v6581_v21 = vld [vmem:[#allocation2 + $0x4c] sm:$0x1]  ;;  %v3598_v51 = vsel %vm6222_vm11, %v4536_v60, %v3597_v57 }
 0x2f1   : > { %5256 = vmatprep.subr.bf16.mxu1 %v5626_v0  ;;  %v3401_v38 = vshll.u32 %v6581_v21, 16  ;;  %v4558_v62 = vcombine.low %v3594_v42, %v3598_v51  ;;  %v3613_v12 = vrot.slane %v6581_v21, 5 }
 0x2f3   : > { %v3403_v61 = vrot.slane %v3401_v38, 5 }
 0x2f4   : > { %5257 = vmatpush3.bf16.msra.mxu1 %v5626_v0  ;;  %v6586_v0 = vld [vmem:[#allocation2 + $0x44] sm:$0x1] }
 0x2f5   : > { %5258 = vmatprep.subr.bf16.mxu1 %v5627_v32  ;;  %v3404_v15 = vsel %vm6158_vm8, %v3399_v5, %v3403_v61  ;;  %v3609_v38 = vrot.slane %v6586_v0, 5 }
 0x2f8   : > { %5259 = vmatpush3.bf16.msra.mxu1 %v5627_v32  ;;  %v3387_v32 = vshll.u32 %v6586_v0, 16  ;;  %v3779_v0 = vpack.c.bf16 %v4574_v31, %v4573_v13 }
 0x2f9   : > { %5260 = vmatprep.subr.bf16.mxu1 %v5628_v40 }
 0x2fc   : > { %5261 = vmatpush3.bf16.msra.mxu1 %v5628_v40  ;;  %v3389_v40 = vrot.slane %v3387_v32, 5  ;;  %v3610_v32 = vsel %vm6222_vm11, %v4539_v11, %v3609_v38 }
 0x2fd   : > { %5262 = vmatprep.subr.bf16.mxu1 %v5629_v56 }
 0x2fe   : > { %v3390_v37 = vsel %vm6158_vm8, %v3385_v34, %v3389_v40 }
 0x2ff   : > { %v4524_v19 = vcombine.low %v3390_v37, %v3404_v15 }
 0x300   : > { %5263 = vmatpush3.bf16.msra.mxu1 %v5629_v56  ;;  %v5642_v56 = vld [vmem:[%s6680_s3 + $0x230] sm:$0xff]  }
 0x301   : > { %5272 = vmatprep.subr.bf16.mxu1 %v5630_v7 }
 0x303   : > { %5265 = vmatmul.mubr.bf16.vlgmr.msra.gmra.mrb[0].mxu1 %v4522_v17 }
 0x304   : > { %5268 = vmatprep.mubr.bf16.mxu1 %v4523_v33  ;;  %5273 = vmatpush3.bf16.msra.mxu1 %v5630_v7  ;;  %v3605_v7 = vrot.slane %v6573_v50, 5  ;;  %v4540_v50 = vrot.slane %v3566_v8, 9 }
 0x305   : > { %5274 = vmatprep.subr.bf16.mxu1 %v5632_v26 }
 0x306   : > { %v3606_v20 = vsel %vm6222_vm11, %v4538_v43, %v3605_v7  ;;  %v3614_v16 = vsel %vm6222_vm11, %v4540_v50, %v3613_v12 }
 0x307   : > { %v4559_v28 = vcombine.low %v3602_v10, %v3606_v20  ;;  %v4560_v21 = vcombine.low %v3610_v32, %v3614_v16 }
 0x308   : > { %5275 = vmatpush3.bf16.msra.mxu1 %v5632_v26 }
 0x309   : > { %5276 = vmatprep.subr.bf16.mxu1 %v5634_v27 }
 0x30b   : > { %5269 = vmatmul.mubr.bf16.gmra.mrb[4].mxu1 %v4524_v19 }
 0x30c   : > { %5277 = vmatpush3.bf16.msra.mxu1 %v5634_v27  ;;  %5288 = vmatprep.mubr.bf16.mxu1 %v4557_v53 }
 0x30d   : > { %5278 = vmatprep.subr.bf16.mxu1 %v5636_v46 }
 0x310   : > { %5279 = vmatpush3.bf16.msra.mxu1 %v5636_v46 }
 0x311   : > { %5280 = vmatprep.subr.bf16.mxu1 %v5638_v1 }
 0x314   : > { %5281 = vmatpush3.bf16.msra.mxu1 %v5638_v1 }
 0x315   : > { %5282 = vmatprep.subr.bf16.mxu1 %v5640_v44 }
 0x318   : > { %5283 = vmatpush3.bf16.msra.mxu1 %v5640_v44 }
 0x319   : > { %5284 = vmatprep.subr.bf16.mxu1 %v5642_v56 }
 0x31c   : > { %5285 = vmatpush3.bf16.msra.mxu1 %v5642_v56 }
 0x31d   : > { %5286 = vmatprep.subr.bf16.mxu1 %v5644_v54 }
 0x320   : > { %5287 = vmatpush3.bf16.msra.mxu1 %v5644_v54 }
 0x321   : > { %5320 = vmatprep.subr.bf16.mxu1 %v6354_v63 }
 0x323   : > { %5289 = vmatmul.mubr.bf16.vlgmr.msra.gmra.mrb[0].mxu1 %v4558_v62 }
 0x324   : > { %5292 = vmatprep.mubr.bf16.mxu1 %v4559_v28  ;;  %5328 = vmatpush3.bf16.msra.mxu1 %v6354_v63  ;;  %v4576_v63 = vld [vmem:[%s5719_s8 + $0x220] sm:$0xff]  ;;  %s4596_s8 = sshll.u32 %s6693_s22, 5 }
 0x325   : > { %5321 = vmatprep.subr.bf16.mxu1 %v6363_v55  ;;  %s251_s19 = scalar_lea.vmem %s6683_s6, %s4596_s8 }
 0x328   : > { %5329 = vmatpush3.bf16.msra.mxu1 %v6363_v55  ;;  %v3780_v55 = vpack.c.bf16 %v4576_v63, %v4575_v9 }
 0x329   : > { %5322 = vmatprep.subr.bf16.mxu1 %v6378_v6 }
 0x32b   : > { %5293 = vmatmul.mubr.bf16.gmra.mrb[4].mxu1 %v4560_v21 }
 0x32c   : > { %5330 = vmatpush3.bf16.msra.mxu1 %v6378_v6  ;;  %5316 = vmatprep.mubr.bf16.mxu1 %v3779_v0 }
 0x32d   : > { %5323 = vmatprep.subr.bf16.mxu1 %v6387_v14 }
 0x330   : > { %5331 = vmatpush3.bf16.msra.mxu1 %v6387_v14 }
 0x331   : > { %5324 = vmatprep.subr.bf16.mxu1 %v6397_v25 }
 0x334   : > { %5332 = vmatpush3.bf16.msra.mxu1 %v6397_v25 }
 0x335   : > { %5325 = vmatprep.subr.bf16.mxu1 %v6409_v22 }
 0x338   : > { %5333 = vmatpush3.bf16.msra.mxu1 %v6409_v22  ;;  %v4585_v22 = vld [vmem:[%s6682_s5] ss:$0 sm:$0xff] }
 0x339   : > { %5326 = vmatprep.subr.bf16.mxu1 %v6427_v47 }
 0x33c   : > { %5334 = vmatpush3.bf16.msra.mxu1 %v6427_v47 }
 0x33d   : > { %5327 = vmatprep.subr.bf16.mxu1 %v6441_v49 }
 0x340   : > { %5335 = vmatpush3.bf16.msra.mxu1 %v6441_v49 }
 0x343   : > { %5317 = vmatmul.mubr.bf16.vlgmr.msra.gmra.mrb[4].mxu1 %v3780_v55 }
 0x35c   : > { %v5314_v6 = vpop.f32.mrb[8].mxu0 }
 0x35d   : > { %v3879_v14 = vpop.f32.mrb[9].mxu0 }
 0x35e   : > { %v5315_v25 = vpop.f32.mrb[10].mxu0 }
 0x35f   : > { %v3882_v17 = vpop.f32.mrb[11].mxu0 }
 0x3f6   : > { %v5290_v30 = vpop.f32.mrb[0].mxu1 }
 0x3f7   : > { %v5336_v26 = vadd.f32 %v5314_v6, %v5290_v30  ;;  %v3730_v47 = vpop.f32.mrb[1].mxu1 }
 0x3f8   : > { %v5337_v33 = vadd.f32 %v3879_v14, %v3730_v47  ;;  %v5291_v34 = vpop.f32.mrb[2].mxu1 }
 0x3f9   : > { %v3927_v5 = vadd.f32 %v5336_v26, %v4585_v22  ;;  %v5338_v61 = vadd.f32 %v5315_v25, %v5291_v34  ;;  %v3733_v18 = vpop.f32.mrb[3].mxu1 }
 0x3fa   : > { %v3925_v35 = vadd.f32 %v5337_v33, %v4585_v22  ;;  %v5339_v49 = vadd.f32 %v3882_v17, %v3733_v18 }
 0x3fb   : > { %v3928_v39 = vadd.f32 %v5338_v61, %v4585_v22  ;;  %v3935_v27 = vmax.f32 %v3927_v5, 0.0 }
 0x3fc   : > { %v3926_v40 = vadd.f32 %v5339_v49, %v4585_v22  ;;  %v3933_v36 = vmax.f32 %v3925_v35, 0.0 }
 0x3fd   : > { %v3936_v29 = vmax.f32 %v3928_v39, 0.0 }
 0x3fe   : > { %v3934_v37 = vmax.f32 %v3926_v40, 0.0 }
 0x3ff   : > { %v4621_v15 = vpack.c.bf16 %v3936_v29, %v3935_v27 }
 0x400   : > { %v4616_v48 = vpack.c.bf16 %v3934_v37, %v3933_v36 }
 0x401   : > { %4633 = vst [vmem:[%s251_s19 + $0x8] sm:$0xff] %v4621_v15  }
 0x402   : > { %4617 = vst [vmem:[%s251_s19] sm:$0xff] %v4616_v48  }
 0x416   : > { %v5318_v19 = vpop.f32.mrb[4].mxu1 }
 0x417   : > { %v3931_v45 = vadd.f32 %v5318_v19, %v4585_v22  ;;  %v3895_v46 = vpop.f32.mrb[5].mxu1 }
 0x418   : > { %v3929_v53 = vadd.f32 %v4585_v22, %v3895_v46  ;;  %v5319_v1 = vpop.f32.mrb[6].mxu1 }
 0x419   : > { %v3932_v44 = vadd.f32 %v5319_v1, %v4585_v22  ;;  %v3898_v56 = vpop.f32.mrb[7].mxu1  ;;  %v3939_v52 = vmax.f32 %v3931_v45, 0.0 }
 0x41a   : > { %v3930_v41 = vadd.f32 %v4585_v22, %v3898_v56  ;;  %v3937_v59 = vmax.f32 %v3929_v53, 0.0 }
 0x41b   : > { %v3940_v54 = vmax.f32 %v3932_v44, 0.0 }
 0x41c   : > { %v3938_v60 = vmax.f32 %v3930_v41, 0.0 }
 0x41d   : > { %v4631_v57 = vpack.c.bf16 %v3940_v54, %v3939_v52 }
 0x41e   : > { %v4626_v2 = vpack.c.bf16 %v3938_v60, %v3937_v59 }
 0x41f   : > { %4635 = vst [vmem:[%s251_s19 + $0x18] sm:$0xff] %v4631_v57  }
 0x420   : > { %4634 = vst [vmem:[%s251_s19 + $0x10] sm:$0xff] %v4626_v2  }
 0x421 PF: > { %s16_s21 = sadd.s32 1, %s5658_s21  }
 0x422   : > { %p13_p4 = scmp.ge.s32.totalorder %s16_s21, 4  }
 0x424   :  { %15 = sbr.rel (!%p13_p4) target bundleno = 1 (0x1), region = 97 }

</bundles_post_ra>
